<compile_context>
chip_gen: v6e
topology: v6e:2x2x1
jax: 0.10.0
libtpu: 0.0.40
codegen_flags: <defaults>
</compile_context>

<pallas_src>
import math
from collections import defaultdict, deque
from functools import partial

import numpy as np
import jax
import jax.numpy as jnp
from jax.experimental import pallas as pl
from jax.experimental.pallas import tpu as pltpu


_LAYER_KEYS = ("wqkv", "bqkv", "wo", "bo", "w1", "b1", "w2", "b2",
               "ln1w", "ln1b", "ln2w", "ln2b")


def _round_up(a, m):
    return (a + m - 1) // m * m


# ----------------------------------------------------------------------------
# In-kernel math helpers
# ----------------------------------------------------------------------------
def _layernorm(x, w, b, eps=1e-5):
    mu = jnp.mean(x, axis=-1, keepdims=True)
    xc = x - mu
    var = jnp.mean(xc * xc, axis=-1, keepdims=True)
    return xc * jax.lax.rsqrt(var + eps) * w + b


def _gelu_tanh(x):
    # TODO(synk): PyTorch's activation='gelu' is the exact erf GELU; erf has no
    # reliable Mosaic lowering, so the tanh approximation is used (|diff| ~1e-3).
    c = math.sqrt(2.0 / math.pi)
    return 0.5 * x * (1.0 + jnp.tanh(c * (x + 0.044715 * x * x * x)))


def _tx_layer(x, mask, wqkv, bqkv, wo, bo, w1, b1, w2, b2,
              ln1w, ln1b, ln2w, ln2b, *, nhead, activation):
    """One post-norm nn.TransformerEncoderLayer (eval mode) on a flattened batch.

    x:    (B*S, H)  — all sequences stacked along the sublane axis.
    mask: (B*S, B*S) float; 1.0 = key j NOT attendable from query i (encodes both
          the block-diagonal batch structure and key padding).
    """
    BS, H = x.shape
    hd = H // nhead
    scale = 1.0 / math.sqrt(hd)

    qkv = jnp.dot(x, wqkv, preferred_element_type=jnp.float32) + bqkv     # (BS, 3H)

    heads = []
    for h in range(nhead):
        qh = qkv[:, h * hd:(h + 1) * hd]
        kh = qkv[:, H + h * hd:H + (h + 1) * hd]
        vh = qkv[:, 2 * H + h * hd:2 * H + (h + 1) * hd]
        s = jax.lax.dot_general(qh, kh, (((1,), (1,)), ((), ())),
                                preferred_element_type=jnp.float32) * scale   # (BS, BS)
        s = jnp.where(mask > 0.5, -1e30, s)      # finite mask: no -inf-(-inf) NaN
        s = s - jnp.max(s, axis=-1, keepdims=True)
        p = jnp.exp(s)
        p = p * pl.reciprocal(jnp.sum(p, axis=-1, keepdims=True), approx=True)
        heads.append(jnp.dot(p, vh, preferred_element_type=jnp.float32))      # (BS, hd)
    # Fused output projection: one (BS,H)@(H,H) matmul instead of nhead small ones.
    attn = jnp.dot(jnp.concatenate(heads, axis=-1), wo,
                   preferred_element_type=jnp.float32) + bo

    x = _layernorm(x + attn, ln1w, ln1b)

    hdn = jnp.dot(x, w1, preferred_element_type=jnp.float32) + b1
    hdn = jnp.maximum(hdn, 0.0) if activation == "relu" else _gelu_tanh(hdn)
    ff = jnp.dot(hdn, w2, preferred_element_type=jnp.float32) + b2
    return _layernorm(x + ff, ln2w, ln2b)


# ----------------------------------------------------------------------------
# Kernel 1: fused node embedding + gelu transformer stack (BertEncoder)
# ----------------------------------------------------------------------------
def _bert_encoder_kernel(xp_ref, oth_ref, mask_ref,
                         fw_ref, fb_ref, pwx_ref, pwo_ref, pb_ref,
                         wqkv_ref, bqkv_ref, wo_ref, bo_ref,
                         w1_ref, b1_ref, w2_ref, b2_ref,
                         ln1w_ref, ln1b_ref, ln2w_ref, ln2b_ref,
                         o_ref, h_scr, *, nhead):
    layer = pl.program_id(0)

    # Layer 0 prologue: GRAPH_BERT_EMBEDDINGS.  output_projection over the 4H-wide
    # concat is split into two matmuls (e_x part and structural-embedding part).
    @pl.when(layer == 0)
    def _():
        e_x = jnp.dot(xp_ref[...], fw_ref[...],
                      preferred_element_type=jnp.float32) + fb_ref[...]
        h_scr[...] = (jnp.dot(e_x, pwx_ref[...], preferred_element_type=jnp.float32)
                      + jnp.dot(oth_ref[...], pwo_ref[...],
                                preferred_element_type=jnp.float32)
                      + pb_ref[...])

    h_scr[...] = _tx_layer(h_scr[...], mask_ref[...],
                           wqkv_ref[...], bqkv_ref[...], wo_ref[...], bo_ref[...],
                           w1_ref[...], b1_ref[...], w2_ref[...], b2_ref[...],
                           ln1w_ref[...], ln1b_ref[...], ln2w_ref[...], ln2b_ref[...],
                           nhead=nhead, activation="gelu")

    @pl.when(layer == pl.num_programs(0) - 1)
    def _():
        o_ref[...] = h_scr[...]


# ----------------------------------------------------------------------------
# Kernel 2: fused relu transformer stack + u_mlp + FeatureDecoder
# ----------------------------------------------------------------------------
def _decoder_kernel(z_ref, mask_ref,
                    wqkv_ref, bqkv_ref, wo_ref, bo_ref,
                    w1_ref, b1_ref, w2_ref, b2_ref,
                    ln1w_ref, ln1b_ref, ln2w_ref, ln2b_ref,
                    uw1_ref, ub1_ref, uw2_ref, ub2_ref,
                    dw1_ref, db1_ref, dw2_ref, db2_ref,
                    enc_ref, xr_ref, y_scr, *, nhead):
    layer = pl.program_id(0)

    @pl.when(layer == 0)
    def _():
        y_scr[...] = z_ref[...]
        xr_ref[...] = jnp.zeros_like(xr_ref)

    y = _tx_layer(y_scr[...], mask_ref[...],
                  wqkv_ref[...], bqkv_ref[...], wo_ref[...], bo_ref[...],
                  w1_ref[...], b1_ref[...], w2_ref[...], b2_ref[...],
                  ln1w_ref[...], ln1b_ref[...], ln2w_ref[...], ln2b_ref[...],
                  nhead=nhead, activation="relu")
    y_scr[...] = y
    enc_ref[...] = y

    # Last-layer epilogue: u_mlp (Linear->ReLU->Linear) and FeatureDecoder
    # (Linear->LeakyReLU(0.1)->Linear) on every row; CLS / padded rows are
    # discarded by the caller (cheap at these sizes, keeps shapes static).
    @pl.when(layer == pl.num_programs(0) - 1)
    def _():
        h = jnp.maximum(jnp.dot(y, uw1_ref[...],
                                preferred_element_type=jnp.float32) + ub1_ref[...], 0.0)
        up = jnp.dot(h, uw2_ref[...], preferred_element_type=jnp.float32) + ub2_ref[...]
        d = jnp.dot(up, dw1_ref[...], preferred_element_type=jnp.float32) + db1_ref[...]
        d = jnp.where(d >= 0.0, d, 0.1 * d)      # nn.LeakyReLU(0.1) per reference
        xr_ref[...] = jnp.dot(d, dw2_ref[...],
                              preferred_element_type=jnp.float32) + db2_ref[...]


# ----------------------------------------------------------------------------
# BlockSpec helpers
# ----------------------------------------------------------------------------
def _const_spec(a):
    nd = a.ndim
    return pl.BlockSpec(a.shape, lambda l: (0,) * nd)


def _layer_spec(a):
    nd1 = a.ndim - 1
    return pl.BlockSpec((None,) + a.shape[1:], lambda l: (l,) + (0,) * nd1)


# ----------------------------------------------------------------------------
# pallas_call wrappers
# ----------------------------------------------------------------------------
def run_bert_encoder(x_nodes, prep, enc_params, cfg):
    """BertEncoder.forward (training=False) for the whole padded batch."""
    H, nhead = cfg["hidden_dim"], cfg["nhead"]
    BS = prep["BS_enc"]
    F = x_nodes.shape[1]

    xp = jnp.zeros((BS, F), jnp.float32).at[prep["enc_rows"]].set(x_nodes)

    ne = enc_params["node_emb"]
    layers = enc_params["enc_layers"]
    L = int(layers["wqkv"].shape[0])

    const_inputs = [xp, prep["others"], prep["mask_enc"],
                    ne["feat_w"], ne["feat_b"], ne["proj_w_x"], ne["proj_w_o"],
                    ne["proj_b"]]
    layer_inputs = [layers[k] for k in _LAYER_KEYS]

    h = pl.pallas_call(
        partial(_bert_encoder_kernel, nhead=nhead),
        out_shape=jax.ShapeDtypeStruct((BS, H), jnp.float32),
        grid=(L,),
        in_specs=([_const_spec(a) for a in const_inputs]
                  + [_layer_spec(a) for a in layer_inputs]),
        out_specs=pl.BlockSpec((BS, H), lambda l: (0, 0)),
        scratch_shapes=[pltpu.VMEM((BS, H), jnp.float32)],
        compiler_params=pltpu.CompilerParams(dimension_semantics=("arbitrary",)),
    )(*const_inputs, *layer_inputs)

    return h[prep["enc_rows"]]          # (N, H) in global node order


def run_decoder_stack(z_nodes, prep, params, cfg):
    """Second TransformerEncoder (+CLS) fused with u_mlp and FeatureDecoder."""
    H, nhead = cfg["hidden_dim"], cfg["nhead"]
    B = prep["num_graphs"]
    BS2 = prep["BS_tx2"]
    F = params["dec"]["w2"].shape[1]

    zp = jnp.zeros((BS2, H), jnp.float32)
    zp = zp.at[prep["cls_rows"]].set(
        jnp.broadcast_to(params["cls_token"][0], (B, H)))
    zp = zp.at[prep["node_rows"]].set(z_nodes)

    layers = params["tx2_layers"]
    L = int(layers["wqkv"].shape[0])
    const_inputs = [zp, prep["mask_tx2"]]
    layer_inputs = [layers[k] for k in _LAYER_KEYS]
    mlp_inputs = [params["u_mlp"]["w1"], params["u_mlp"]["b1"],
                  params["u_mlp"]["w2"], params["u_mlp"]["b2"],
                  params["dec"]["w1"], params["dec"]["b1"],
                  params["dec"]["w2"], params["dec"]["b2"]]

    enc, xrec = pl.pallas_call(
        partial(_decoder_kernel, nhead=nhead),
        out_shape=(jax.ShapeDtypeStruct((BS2, H), jnp.float32),
                   jax.ShapeDtypeStruct((BS2, F), jnp.float32)),
        grid=(L,),
        in_specs=([_const_spec(a) for a in const_inputs]
                  + [_layer_spec(a) for a in layer_inputs]
                  + [_const_spec(a) for a in mlp_inputs]),
        out_specs=(pl.BlockSpec((BS2, H), lambda l: (0, 0)),
                   pl.BlockSpec((BS2, F), lambda l: (0, 0))),
        scratch_shapes=[pltpu.VMEM((BS2, H), jnp.float32)],
        compiler_params=pltpu.CompilerParams(dimension_semantics=("arbitrary",)),
    )(*const_inputs, *layer_inputs, *mlp_inputs)

    cls_output = enc[prep["cls_rows"]]     # (B, H)
    x_recon = xrec[prep["node_rows"]]      # (N, F)
    return cls_output, x_recon


# ----------------------------------------------------------------------------
# Host-side graph preprocessing (mirrors the PyTorch reference, incl. its
# local-vs-global index quirks).  Depends only on the graph structure, so it is
# computed once and reused by both encoder passes.
# ----------------------------------------------------------------------------
def _adj_from_edges(edges):
    adj = defaultdict(list)
    for s, d in edges:
        adj[s].append(d)
        adj[d].append(s)
    return adj


def get_wl_labels(edges, num_nodes):
    adj = _adj_from_edges(edges)
    return np.array([len(adj[i]) for i in range(num_nodes)], dtype=np.float32)


def get_hop_distances(edges, num_nodes, source):
    adj = _adj_from_edges(edges)
    dist = np.full(num_nodes, np.inf, dtype=np.float32)
    dist[source] = 0.0
    queue, visited = deque([source]), {source}
    while queue:
        node = queue.popleft()
        for nb in adj[node]:
            if nb not in visited:
                visited.add(nb)
                dist[nb] = dist[node] + 1.0
                queue.append(nb)
    finite = dist[dist != np.inf]
    max_d = finite.max()
    dist[dist == np.inf] = max_d + 1.0
    return dist


def position_embed(pos, d_model):
    pos = np.asarray(pos, np.float32)
    div_term = np.power(10000.0,
                        np.arange(0, d_model, 2, dtype=np.float32) / d_model)
    ang = pos[:, None] / div_term[None, :]
    pe = np.zeros((pos.shape[0], d_model), np.float32)
    pe[:, 0::2] = np.sin(ang)
    pe[:, 1::2] = np.cos(ang)
    return pe


def _attn_mask(counts, S, with_cls):
    """(B*S, B*S) float mask; 1.0 = key not attendable (cross-graph or padding)."""
    B = len(counts)
    m = np.ones((B * S, B * S), np.float32)
    for i, n in enumerate(counts):
        valid = np.zeros(S, np.float32)
        if with_cls:
            valid[0] = 1.0
            valid[1:1 + n] = 1.0
        else:
            valid[:n] = 1.0
        m[i * S:(i + 1) * S, i * S:(i + 1) * S] = 1.0 - valid[None, :]
    return m


def precompute_graph_static(edge_index, batch, num_graphs, cfg):
    H, max_nodes = cfg["hidden_dim"], cfg["max_nodes"]
    batch = np.asarray(batch)
    edge_index = np.asarray(edge_index)

    S_enc = _round_up(max_nodes, 8)          # sublane-aligned static seq length
    S_tx2 = _round_up(max_nodes + 1, 8)      # +1 for the CLS token

    counts, enc_rows, node_rows, cls_rows = [], [], [], []
    others = np.zeros((num_graphs * S_enc, 3 * H), np.float32)

    for i in range(num_graphs):
        idx = np.where(batch == i)[0]
        n = int(idx.shape[0])
        counts.append(n)
        enc_rows.extend((i * S_enc + np.arange(n)).tolist())
        cls_rows.append(i * S_tx2)
        node_rows.extend((i * S_tx2 + 1 + np.arange(n)).tolist())

        # subgraph edges keep GLOBAL node ids (reference behaviour, quirks included)
        emask = np.isin(edge_index[0], idx) & np.isin(edge_index[1], idx)
        sub_edges = [(int(edge_index[0, e]), int(edge_index[1, e]))
                     for e in np.where(emask)[0]]
        e_wl = position_embed(get_wl_labels(sub_edges, n), H)
        e_pos = position_embed(np.arange(n, dtype=np.float32), H)
        e_hop = np.stack(
            [position_embed(get_hop_distances(sub_edges, n, j), H).mean(axis=0)
             for j in range(n)], axis=0)
        others[i * S_enc:i * S_enc + n] = np.concatenate([e_wl, e_pos, e_hop],
                                                         axis=-1)

    return {
        "num_graphs": num_graphs,
        "counts": counts,
        "S_enc": S_enc, "S_tx2": S_tx2,
        "BS_enc": num_graphs * S_enc, "BS_tx2": num_graphs * S_tx2,
        "enc_rows": jnp.asarray(np.array(enc_rows, np.int32)),
        "cls_rows": jnp.asarray(np.array(cls_rows, np.int32)),
        "node_rows": jnp.asarray(np.array(node_rows, np.int32)),
        "others": jnp.asarray(others),
        "mask_enc": jnp.asarray(_attn_mask(counts, S_enc, with_cls=False)),
        "mask_tx2": jnp.asarray(_attn_mask(counts, S_tx2, with_cls=True)),
    }


# ----------------------------------------------------------------------------
# Model forward
# ----------------------------------------------------------------------------
def graph_autoencoder_forward(x, edge_index, batch, num_graphs, params, cfg):
    """GRAPH_AUTOENCODER.forward with mask_indices=None (inference branch)."""
    prep = precompute_graph_static(edge_index, batch, num_graphs, cfg)
    x = jnp.asarray(x, jnp.float32)

    # encoder pass #1 (one fused pallas_call)
    z = run_bert_encoder(x, prep, params["encoder"], cfg)

    # second transformer stack (+CLS) + u_mlp + feature decoder (one fused call)
    cls_output, x_recon = run_decoder_stack(z, prep, params, cfg)

    # encoder pass #2 on reconstructed features (same static shapes / same kernel)
    z_ = run_bert_encoder(x_recon, prep, params["encoder"], cfg)
    return cls_output, z, z_


# ----------------------------------------------------------------------------
# Deterministic parameter init (xavier-uniform weights, zero biases, LN = (1, 0))
# Weights stored as (in_features, out_features); transformer layer params are
# stacked along a leading layer axis so one pallas_call can index them per layer.
# ----------------------------------------------------------------------------
def _xavier(key, fan_in, fan_out):
    lim = math.sqrt(6.0 / (fan_in + fan_out))
    return jax.random.uniform(key, (fan_in, fan_out), jnp.float32, -lim, lim)


def _make_stacked_layers(key, L, H, ff):
    def one(k):
        ks = jax.random.split(k, 4)
        return {
            "wqkv": _xavier(ks[0], H, 3 * H), "bqkv": jnp.zeros((1, 3 * H), jnp.float32),
            "wo": _xavier(ks[1], H, H),       "bo": jnp.zeros((1, H), jnp.float32),
            "w1": _xavier(ks[2], H, ff),      "b1": jnp.zeros((1, ff), jnp.float32),
            "w2": _xavier(ks[3], ff, H),      "b2": jnp.zeros((1, H), jnp.float32),
            "ln1w": jnp.ones((1, H), jnp.float32), "ln1b": jnp.zeros((1, H), jnp.float32),
            "ln2w": jnp.ones((1, H), jnp.float32), "ln2b": jnp.zeros((1, H), jnp.float32),
        }
    per_layer = [one(k) for k in jax.random.split(key, L)]
    return {k: jnp.stack([p[k] for p in per_layer], axis=0) for k in _LAYER_KEYS}


def init_params(key, num_features, H, num_layers):
    ks = jax.random.split(key, 8)
    proj_w = _xavier(ks[1], 4 * H, H)
    return {
        "encoder": {
            "node_emb": {
                "feat_w": _xavier(ks[0], num_features, H),
                "feat_b": jnp.zeros((1, H), jnp.float32),
                # output_projection split: rows [:H] act on e_x, rows [H:] on the
                # concatenated (wl, pos, hop) embeddings — same math as the single
                # (4H, H) matmul over the concat, without an in-kernel concat.
                "proj_w_x": proj_w[:H],
                "proj_w_o": proj_w[H:],
                "proj_b": jnp.zeros((1, H), jnp.float32),
            },
            "enc_layers": _make_stacked_layers(ks[2], num_layers, H, 4 * H),
        },
        "tx2_layers": _make_stacked_layers(ks[3], num_layers, H, 4 * H),
        "u_mlp": {
            "w1": _xavier(ks[4], H, H), "b1": jnp.zeros((1, H), jnp.float32),
            "w2": _xavier(ks[5], H, H), "b2": jnp.zeros((1, H), jnp.float32),
        },
        "dec": {
            "w1": _xavier(ks[6], H, H // 2),
            "b1": jnp.zeros((1, H // 2), jnp.float32),
            "w2": _xavier(ks[7], H // 2, num_features),
            "b2": jnp.zeros((1, num_features), jnp.float32),
        },
        "cls_token": jax.random.normal(jax.random.fold_in(key, 99), (1, 1, H),
                                       jnp.float32),
    }


# ----------------------------------------------------------------------------
if __name__ == "__main__":
    key = jax.random.PRNGKey(0)
    kx, kp = jax.random.split(key)

    NUM_FEATURES, HIDDEN, MAX_NODES, NHEAD, NUM_LAYERS = 4, 32, 8, 4, 2
    cfg = {"hidden_dim": HIDDEN, "max_nodes": MAX_NODES, "nhead": NHEAD}

    # 3 small graphs with 5, 4, 6 nodes (batch is sorted, as PyG batches are).
    batch = np.array([0] * 5 + [1] * 4 + [2] * 6, dtype=np.int32)
    N = batch.shape[0]
    num_graphs = 3
    edge_index = np.array(
        [[0, 1, 2, 3, 5, 6, 7, 9, 10, 11, 12, 13],
         [1, 2, 3, 4, 6, 7, 8, 10, 11, 12, 13, 14]], dtype=np.int32)
    x = jax.random.normal(kx, (N, NUM_FEATURES), jnp.float32)

    params = init_params(kp, NUM_FEATURES, HIDDEN, NUM_LAYERS)

    cls_out, z, z_ = graph_autoencoder_forward(
        x, edge_index, batch, num_graphs, params, cfg)
    jax.block_until_ready((cls_out, z, z_))

    assert cls_out.shape == (num_graphs, HIDDEN)
    assert z.shape == (N, HIDDEN) and z_.shape == (N, HIDDEN)
    assert bool(jnp.all(jnp.isfinite(cls_out)))
    assert bool(jnp.all(jnp.isfinite(z))) and bool(jnp.all(jnp.isfinite(z_)))
    print("KERNEL_OK")
</pallas_src>

<mosaic_0001>
module attributes {stable_mosaic.version = 11 : i64} {
  func.func @_bert_encoder_kernel(%arg0: i32, %arg1: memref<24x4xf32, #tpu.memory_space<vmem>>, %arg2: memref<24x96xf32, #tpu.memory_space<vmem>>, %arg3: memref<24x24xf32, #tpu.memory_space<vmem>>, %arg4: memref<4x32xf32, #tpu.memory_space<vmem>>, %arg5: memref<1x32xf32, #tpu.memory_space<vmem>>, %arg6: memref<32x32xf32, #tpu.memory_space<vmem>>, %arg7: memref<96x32xf32, #tpu.memory_space<vmem>>, %arg8: memref<1x32xf32, #tpu.memory_space<vmem>>, %arg9: memref<1x32x96xf32, #tpu.memory_space<vmem>>, %arg10: memref<1x1x96xf32, #tpu.memory_space<vmem>>, %arg11: memref<1x32x32xf32, #tpu.memory_space<vmem>>, %arg12: memref<1x1x32xf32, #tpu.memory_space<vmem>>, %arg13: memref<1x32x128xf32, #tpu.memory_space<vmem>>, %arg14: memref<1x1x128xf32, #tpu.memory_space<vmem>>, %arg15: memref<1x128x32xf32, #tpu.memory_space<vmem>>, %arg16: memref<1x1x32xf32, #tpu.memory_space<vmem>>, %arg17: memref<1x1x32xf32, #tpu.memory_space<vmem>>, %arg18: memref<1x1x32xf32, #tpu.memory_space<vmem>>, %arg19: memref<1x1x32xf32, #tpu.memory_space<vmem>>, %arg20: memref<1x1x32xf32, #tpu.memory_space<vmem>>, %arg21: memref<24x32xf32, #tpu.memory_space<vmem>>, %arg22: memref<24x32xf32, #tpu.memory_space<vmem>>) attributes {dimension_semantics = [#tpu.dimension_semantics<arbitrary>], iteration_bounds = array<i64: 2>, scalar_prefetch = 0 : i64, scratch_operands = 1 : i64, tpu.core_type = #tpu.core_type<tc>, window_params = [{pipeline_mode = #tpu.pipeline_mode<synchronous>, transform_indices = @transform_0, window_bounds = array<i64: 24, 4>}, {pipeline_mode = #tpu.pipeline_mode<synchronous>, transform_indices = @transform_1, window_bounds = array<i64: 24, 96>}, {pipeline_mode = #tpu.pipeline_mode<synchronous>, transform_indices = @transform_2, window_bounds = array<i64: 24, 24>}, {pipeline_mode = #tpu.pipeline_mode<synchronous>, transform_indices = @transform_3, window_bounds = array<i64: 4, 32>}, {pipeline_mode = #tpu.pipeline_mode<synchronous>, transform_indices = @transform_4, window_bounds = array<i64: 1, 32>}, {pipeline_mode = #tpu.pipeline_mode<synchronous>, transform_indices = @transform_5, window_bounds = array<i64: 32, 32>}, {pipeline_mode = #tpu.pipeline_mode<synchronous>, transform_indices = @transform_6, window_bounds = array<i64: 96, 32>}, {pipeline_mode = #tpu.pipeline_mode<synchronous>, transform_indices = @transform_7, window_bounds = array<i64: 1, 32>}, {transform_indices = @transform_8, window_bounds = array<i64: 1, 32, 96>}, {transform_indices = @transform_9, window_bounds = array<i64: 1, 1, 96>}, {transform_indices = @transform_10, window_bounds = array<i64: 1, 32, 32>}, {transform_indices = @transform_11, window_bounds = array<i64: 1, 1, 32>}, {transform_indices = @transform_12, window_bounds = array<i64: 1, 32, 128>}, {transform_indices = @transform_13, window_bounds = array<i64: 1, 1, 128>}, {transform_indices = @transform_14, window_bounds = array<i64: 1, 128, 32>}, {transform_indices = @transform_15, window_bounds = array<i64: 1, 1, 32>}, {transform_indices = @transform_16, window_bounds = array<i64: 1, 1, 32>}, {transform_indices = @transform_17, window_bounds = array<i64: 1, 1, 32>}, {transform_indices = @transform_18, window_bounds = array<i64: 1, 1, 32>}, {transform_indices = @transform_19, window_bounds = array<i64: 1, 1, 32>}, {pipeline_mode = #tpu.pipeline_mode<synchronous>, transform_indices = @transform_20, window_bounds = array<i64: 24, 32>}]} {
    %c0_i32 = arith.constant 0 : i32
    %0 = arith.cmpi eq, %arg0, %c0_i32 : i32
    %1 = arith.extui %0 : i1 to i32
    %c0_i32_0 = arith.constant 0 : i32
    %2 = arith.cmpi ne, %1, %c0_i32_0 : i32
    scf.if %2 {
      %c0_88 = arith.constant 0 : index
      %c0_89 = arith.constant 0 : index
      %185 = vector.load %arg1[%c0_88, %c0_89] : memref<24x4xf32, #tpu.memory_space<vmem>>, vector<24x4xf32>
      %c0_90 = arith.constant 0 : index
      %c0_91 = arith.constant 0 : index
      %186 = vector.load %arg4[%c0_90, %c0_91] : memref<4x32xf32, #tpu.memory_space<vmem>>, vector<4x32xf32>
      %cst_92 = arith.constant dense<0.000000e+00> : vector<24x32xf32>
      %187 = tpu.matmul %185, %186, %cst_92 {dimension_numbers = #tpu.dot_dimension_numbers<[1], [0], [0], [1], [0, 0, 1, 1], [], []>} : vector<24x4xf32>, vector<4x32xf32>, vector<24x32xf32> -> vector<24x32xf32>
      %c0_93 = arith.constant 0 : index
      %c0_94 = arith.constant 0 : index
      %188 = vector.load %arg5[%c0_93, %c0_94] : memref<1x32xf32, #tpu.memory_space<vmem>>, vector<1x32xf32>
      %189 = vector.broadcast %188 : vector<1x32xf32> to vector<24x32xf32>
      %190 = arith.addf %187, %189 : vector<24x32xf32>
      %c0_95 = arith.constant 0 : index
      %c0_96 = arith.constant 0 : index
      %191 = vector.load %arg6[%c0_95, %c0_96] : memref<32x32xf32, #tpu.memory_space<vmem>>, vector<32x32xf32>
      %cst_97 = arith.constant dense<0.000000e+00> : vector<24x32xf32>
      %192 = tpu.matmul %190, %191, %cst_97 {dimension_numbers = #tpu.dot_dimension_numbers<[1], [0], [0], [1], [0, 0, 1, 1], [], []>} : vector<24x32xf32>, vector<32x32xf32>, vector<24x32xf32> -> vector<24x32xf32>
      %c0_98 = arith.constant 0 : index
      %c0_99 = arith.constant 0 : index
      %193 = vector.load %arg2[%c0_98, %c0_99] : memref<24x96xf32, #tpu.memory_space<vmem>>, vector<24x96xf32>
      %c0_100 = arith.constant 0 : index
      %c0_101 = arith.constant 0 : index
      %194 = vector.load %arg7[%c0_100, %c0_101] : memref<96x32xf32, #tpu.memory_space<vmem>>, vector<96x32xf32>
      %cst_102 = arith.constant dense<0.000000e+00> : vector<24x32xf32>
      %195 = tpu.matmul %193, %194, %cst_102 {dimension_numbers = #tpu.dot_dimension_numbers<[1], [0], [0], [1], [0, 0, 1, 1], [], []>} : vector<24x96xf32>, vector<96x32xf32>, vector<24x32xf32> -> vector<24x32xf32>
      %196 = arith.addf %192, %195 : vector<24x32xf32>
      %c0_103 = arith.constant 0 : index
      %c0_104 = arith.constant 0 : index
      %197 = vector.load %arg8[%c0_103, %c0_104] : memref<1x32xf32, #tpu.memory_space<vmem>>, vector<1x32xf32>
      %198 = vector.broadcast %197 : vector<1x32xf32> to vector<24x32xf32>
      %199 = arith.addf %196, %198 : vector<24x32xf32>
      %c0_105 = arith.constant 0 : index
      %c0_106 = arith.constant 0 : index
      %200 = vector.load %arg22[%c0_105, %c0_106] : memref<24x32xf32, #tpu.memory_space<vmem>>, vector<24x32xf32>
      tpu.vector_store %arg22[%c0_105, %c0_106], %199 {strides = array<i32>} : memref<24x32xf32, #tpu.memory_space<vmem>>, vector<24x32xf32>,
    } else {
    }
    %c0 = arith.constant 0 : index
    %c0_1 = arith.constant 0 : index
    %3 = vector.load %arg22[%c0, %c0_1] : memref<24x32xf32, #tpu.memory_space<vmem>>, vector<24x32xf32>
    %c0_2 = arith.constant 0 : index
    %c0_3 = arith.constant 0 : index
    %4 = vector.load %arg3[%c0_2, %c0_3] : memref<24x24xf32, #tpu.memory_space<vmem>>, vector<24x24xf32>
    %c0_4 = arith.constant 0 : index
    %c0_5 = arith.constant 0 : index
    %c0_6 = arith.constant 0 : index
    %5 = vector.load %arg9[%c0_4, %c0_5, %c0_6] : memref<1x32x96xf32, #tpu.memory_space<vmem>>, vector<1x32x96xf32>
    %6 = vector.shape_cast %5 : vector<1x32x96xf32> to vector<32x96xf32>
    %c0_7 = arith.constant 0 : index
    %c0_8 = arith.constant 0 : index
    %c0_9 = arith.constant 0 : index
    %7 = vector.load %arg10[%c0_7, %c0_8, %c0_9] : memref<1x1x96xf32, #tpu.memory_space<vmem>>, vector<1x1x96xf32>
    %8 = vector.shape_cast %7 : vector<1x1x96xf32> to vector<1x96xf32>
    %c0_10 = arith.constant 0 : index
    %c0_11 = arith.constant 0 : index
    %c0_12 = arith.constant 0 : index
    %9 = vector.load %arg11[%c0_10, %c0_11, %c0_12] : memref<1x32x32xf32, #tpu.memory_space<vmem>>, vector<1x32x32xf32>
    %10 = vector.shape_cast %9 : vector<1x32x32xf32> to vector<32x32xf32>
    %c0_13 = arith.constant 0 : index
    %c0_14 = arith.constant 0 : index
    %c0_15 = arith.constant 0 : index
    %11 = vector.load %arg12[%c0_13, %c0_14, %c0_15] : memref<1x1x32xf32, #tpu.memory_space<vmem>>, vector<1x1x32xf32>
    %12 = vector.shape_cast %11 : vector<1x1x32xf32> to vector<1x32xf32>
    %c0_16 = arith.constant 0 : index
    %c0_17 = arith.constant 0 : index
    %c0_18 = arith.constant 0 : index
    %13 = vector.load %arg13[%c0_16, %c0_17, %c0_18] : memref<1x32x128xf32, #tpu.memory_space<vmem>>, vector<1x32x128xf32>
    %14 = vector.shape_cast %13 : vector<1x32x128xf32> to vector<32x128xf32>
    %c0_19 = arith.constant 0 : index
    %c0_20 = arith.constant 0 : index
    %c0_21 = arith.constant 0 : index
    %15 = vector.load %arg14[%c0_19, %c0_20, %c0_21] : memref<1x1x128xf32, #tpu.memory_space<vmem>>, vector<1x1x128xf32>
    %16 = vector.shape_cast %15 : vector<1x1x128xf32> to vector<1x128xf32>
    %c0_22 = arith.constant 0 : index
    %c0_23 = arith.constant 0 : index
    %c0_24 = arith.constant 0 : index
    %17 = vector.load %arg15[%c0_22, %c0_23, %c0_24] : memref<1x128x32xf32, #tpu.memory_space<vmem>>, vector<1x128x32xf32>
    %18 = vector.shape_cast %17 : vector<1x128x32xf32> to vector<128x32xf32>
    %c0_25 = arith.constant 0 : index
    %c0_26 = arith.constant 0 : index
    %c0_27 = arith.constant 0 : index
    %19 = vector.load %arg16[%c0_25, %c0_26, %c0_27] : memref<1x1x32xf32, #tpu.memory_space<vmem>>, vector<1x1x32xf32>
    %20 = vector.shape_cast %19 : vector<1x1x32xf32> to vector<1x32xf32>
    %c0_28 = arith.constant 0 : index
    %c0_29 = arith.constant 0 : index
    %c0_30 = arith.constant 0 : index
    %21 = vector.load %arg17[%c0_28, %c0_29, %c0_30] : memref<1x1x32xf32, #tpu.memory_space<vmem>>, vector<1x1x32xf32>
    %22 = vector.shape_cast %21 : vector<1x1x32xf32> to vector<1x32xf32>
    %c0_31 = arith.constant 0 : index
    %c0_32 = arith.constant 0 : index
    %c0_33 = arith.constant 0 : index
    %23 = vector.load %arg18[%c0_31, %c0_32, %c0_33] : memref<1x1x32xf32, #tpu.memory_space<vmem>>, vector<1x1x32xf32>
    %24 = vector.shape_cast %23 : vector<1x1x32xf32> to vector<1x32xf32>
    %c0_34 = arith.constant 0 : index
    %c0_35 = arith.constant 0 : index
    %c0_36 = arith.constant 0 : index
    %25 = vector.load %arg19[%c0_34, %c0_35, %c0_36] : memref<1x1x32xf32, #tpu.memory_space<vmem>>, vector<1x1x32xf32>
    %26 = vector.shape_cast %25 : vector<1x1x32xf32> to vector<1x32xf32>
    %c0_37 = arith.constant 0 : index
    %c0_38 = arith.constant 0 : index
    %c0_39 = arith.constant 0 : index
    %27 = vector.load %arg20[%c0_37, %c0_38, %c0_39] : memref<1x1x32xf32, #tpu.memory_space<vmem>>, vector<1x1x32xf32>
    %28 = vector.shape_cast %27 : vector<1x1x32xf32> to vector<1x32xf32>
    %cst = arith.constant dense<0.000000e+00> : vector<24x96xf32>
    %29 = tpu.matmul %3, %6, %cst {dimension_numbers = #tpu.dot_dimension_numbers<[1], [0], [0], [1], [0, 0, 1, 1], [], []>} : vector<24x32xf32>, vector<32x96xf32>, vector<24x96xf32> -> vector<24x96xf32>
    %30 = vector.broadcast %8 : vector<1x96xf32> to vector<24x96xf32>
    %31 = arith.addf %29, %30 : vector<24x96xf32>
    %32 = vector.extract_strided_slice %31 {offsets = [0, 0], sizes = [24, 8], strides = [1, 1]} : vector<24x96xf32> to vector<24x8xf32>
    %33 = vector.extract_strided_slice %31 {offsets = [0, 32], sizes = [24, 8], strides = [1, 1]} : vector<24x96xf32> to vector<24x8xf32>
    %34 = vector.extract_strided_slice %31 {offsets = [0, 64], sizes = [24, 8], strides = [1, 1]} : vector<24x96xf32> to vector<24x8xf32>
    %cst_40 = arith.constant dense<0.000000e+00> : vector<24x24xf32>
    %35 = tpu.matmul %32, %33, %cst_40 {dimension_numbers = #tpu.dot_dimension_numbers<[1], [1], [0], [0], [0, 0, 1, 0], [], []>} : vector<24x8xf32>, vector<24x8xf32>, vector<24x24xf32> -> vector<24x24xf32>
    %cst_41 = arith.constant 0.353553385 : f32
    %36 = vector.broadcast %cst_41 : f32 to vector<24x24xf32>
    %37 = arith.mulf %35, %36 : vector<24x24xf32>
    %cst_42 = arith.constant 5.000000e-01 : f32
    %38 = vector.broadcast %cst_42 : f32 to vector<24x24xf32>
    %39 = arith.cmpf ogt, %4, %38 : vector<24x24xf32>
    %cst_43 = arith.constant -1.000000e+30 : f32
    %40 = vector.broadcast %cst_43 : f32 to vector<24x24xf32>
    %41 = arith.select %39, %40, %37 : vector<24x24xi1>, vector<24x24xf32>
    %cst_44 = arith.constant dense<0xFF800000> : vector<24xf32>
    %42 = vector.multi_reduction <maximumf>, %41, %cst_44 [1] : vector<24x24xf32> to vector<24xf32>
    %43 = vector.shape_cast %42 : vector<24xf32> to vector<24x1xf32>
    %44 = vector.broadcast %43 : vector<24x1xf32> to vector<24x24xf32>
    %45 = arith.subf %41, %44 : vector<24x24xf32>
    %46 = math.exp %45 : vector<24x24xf32>
    %cst_45 = arith.constant dense<0.000000e+00> : vector<24xf32>
    %47 = vector.multi_reduction <add>, %46, %cst_45 [1] : vector<24x24xf32> to vector<24xf32>
    %48 = vector.shape_cast %47 : vector<24xf32> to vector<24x1xf32>
    %49 = tpu.reciprocal %48 {approx = true} : vector<24x1xf32> -> vector<24x1xf32>
    %50 = vector.broadcast %49 : vector<24x1xf32> to vector<24x24xf32>
    %51 = arith.mulf %46, %50 : vector<24x24xf32>
    %cst_46 = arith.constant dense<0.000000e+00> : vector<24x8xf32>
    %52 = tpu.matmul %51, %34, %cst_46 {dimension_numbers = #tpu.dot_dimension_numbers<[1], [0], [0], [1], [0, 0, 1, 1], [], []>} : vector<24x24xf32>, vector<24x8xf32>, vector<24x8xf32> -> vector<24x8xf32>
    %53 = vector.extract_strided_slice %31 {offsets = [0, 8], sizes = [24, 8], strides = [1, 1]} : vector<24x96xf32> to vector<24x8xf32>
    %54 = vector.extract_strided_slice %31 {offsets = [0, 40], sizes = [24, 8], strides = [1, 1]} : vector<24x96xf32> to vector<24x8xf32>
    %55 = vector.extract_strided_slice %31 {offsets = [0, 72], sizes = [24, 8], strides = [1, 1]} : vector<24x96xf32> to vector<24x8xf32>
    %cst_47 = arith.constant dense<0.000000e+00> : vector<24x24xf32>
    %56 = tpu.matmul %53, %54, %cst_47 {dimension_numbers = #tpu.dot_dimension_numbers<[1], [1], [0], [0], [0, 0, 1, 0], [], []>} : vector<24x8xf32>, vector<24x8xf32>, vector<24x24xf32> -> vector<24x24xf32>
    %cst_48 = arith.constant 0.353553385 : f32
    %57 = vector.broadcast %cst_48 : f32 to vector<24x24xf32>
    %58 = arith.mulf %56, %57 : vector<24x24xf32>
    %cst_49 = arith.constant 5.000000e-01 : f32
    %59 = vector.broadcast %cst_49 : f32 to vector<24x24xf32>
    %60 = arith.cmpf ogt, %4, %59 : vector<24x24xf32>
    %cst_50 = arith.constant -1.000000e+30 : f32
    %61 = vector.broadcast %cst_50 : f32 to vector<24x24xf32>
    %62 = arith.select %60, %61, %58 : vector<24x24xi1>, vector<24x24xf32>
    %cst_51 = arith.constant dense<0xFF800000> : vector<24xf32>
    %63 = vector.multi_reduction <maximumf>, %62, %cst_51 [1] : vector<24x24xf32> to vector<24xf32>
    %64 = vector.shape_cast %63 : vector<24xf32> to vector<24x1xf32>
    %65 = vector.broadcast %64 : vector<24x1xf32> to vector<24x24xf32>
    %66 = arith.subf %62, %65 : vector<24x24xf32>
    %67 = math.exp %66 : vector<24x24xf32>
    %cst_52 = arith.constant dense<0.000000e+00> : vector<24xf32>
    %68 = vector.multi_reduction <add>, %67, %cst_52 [1] : vector<24x24xf32> to vector<24xf32>
    %69 = vector.shape_cast %68 : vector<24xf32> to vector<24x1xf32>
    %70 = tpu.reciprocal %69 {approx = true} : vector<24x1xf32> -> vector<24x1xf32>
    %71 = vector.broadcast %70 : vector<24x1xf32> to vector<24x24xf32>
    %72 = arith.mulf %67, %71 : vector<24x24xf32>
    %cst_53 = arith.constant dense<0.000000e+00> : vector<24x8xf32>
    %73 = tpu.matmul %72, %55, %cst_53 {dimension_numbers = #tpu.dot_dimension_numbers<[1], [0], [0], [1], [0, 0, 1, 1], [], []>} : vector<24x24xf32>, vector<24x8xf32>, vector<24x8xf32> -> vector<24x8xf32>
    %74 = vector.extract_strided_slice %31 {offsets = [0, 16], sizes = [24, 8], strides = [1, 1]} : vector<24x96xf32> to vector<24x8xf32>
    %75 = vector.extract_strided_slice %31 {offsets = [0, 48], sizes = [24, 8], strides = [1, 1]} : vector<24x96xf32> to vector<24x8xf32>
    %76 = vector.extract_strided_slice %31 {offsets = [0, 80], sizes = [24, 8], strides = [1, 1]} : vector<24x96xf32> to vector<24x8xf32>
    %cst_54 = arith.constant dense<0.000000e+00> : vector<24x24xf32>
    %77 = tpu.matmul %74, %75, %cst_54 {dimension_numbers = #tpu.dot_dimension_numbers<[1], [1], [0], [0], [0, 0, 1, 0], [], []>} : vector<24x8xf32>, vector<24x8xf32>, vector<24x24xf32> -> vector<24x24xf32>
    %cst_55 = arith.constant 0.353553385 : f32
    %78 = vector.broadcast %cst_55 : f32 to vector<24x24xf32>
    %79 = arith.mulf %77, %78 : vector<24x24xf32>
    %cst_56 = arith.constant 5.000000e-01 : f32
    %80 = vector.broadcast %cst_56 : f32 to vector<24x24xf32>
    %81 = arith.cmpf ogt, %4, %80 : vector<24x24xf32>
    %cst_57 = arith.constant -1.000000e+30 : f32
    %82 = vector.broadcast %cst_57 : f32 to vector<24x24xf32>
    %83 = arith.select %81, %82, %79 : vector<24x24xi1>, vector<24x24xf32>
    %cst_58 = arith.constant dense<0xFF800000> : vector<24xf32>
    %84 = vector.multi_reduction <maximumf>, %83, %cst_58 [1] : vector<24x24xf32> to vector<24xf32>
    %85 = vector.shape_cast %84 : vector<24xf32> to vector<24x1xf32>
    %86 = vector.broadcast %85 : vector<24x1xf32> to vector<24x24xf32>
    %87 = arith.subf %83, %86 : vector<24x24xf32>
    %88 = math.exp %87 : vector<24x24xf32>
    %cst_59 = arith.constant dense<0.000000e+00> : vector<24xf32>
    %89 = vector.multi_reduction <add>, %88, %cst_59 [1] : vector<24x24xf32> to vector<24xf32>
    %90 = vector.shape_cast %89 : vector<24xf32> to vector<24x1xf32>
    %91 = tpu.reciprocal %90 {approx = true} : vector<24x1xf32> -> vector<24x1xf32>
    %92 = vector.broadcast %91 : vector<24x1xf32> to vector<24x24xf32>
    %93 = arith.mulf %88, %92 : vector<24x24xf32>
    %cst_60 = arith.constant dense<0.000000e+00> : vector<24x8xf32>
    %94 = tpu.matmul %93, %76, %cst_60 {dimension_numbers = #tpu.dot_dimension_numbers<[1], [0], [0], [1], [0, 0, 1, 1], [], []>} : vector<24x24xf32>, vector<24x8xf32>, vector<24x8xf32> -> vector<24x8xf32>
    %95 = vector.extract_strided_slice %31 {offsets = [0, 24], sizes = [24, 8], strides = [1, 1]} : vector<24x96xf32> to vector<24x8xf32>
    %96 = vector.extract_strided_slice %31 {offsets = [0, 56], sizes = [24, 8], strides = [1, 1]} : vector<24x96xf32> to vector<24x8xf32>
    %97 = vector.extract_strided_slice %31 {offsets = [0, 88], sizes = [24, 8], strides = [1, 1]} : vector<24x96xf32> to vector<24x8xf32>
    %cst_61 = arith.constant dense<0.000000e+00> : vector<24x24xf32>
    %98 = tpu.matmul %95, %96, %cst_61 {dimension_numbers = #tpu.dot_dimension_numbers<[1], [1], [0], [0], [0, 0, 1, 0], [], []>} : vector<24x8xf32>, vector<24x8xf32>, vector<24x24xf32> -> vector<24x24xf32>
    %cst_62 = arith.constant 0.353553385 : f32
    %99 = vector.broadcast %cst_62 : f32 to vector<24x24xf32>
    %100 = arith.mulf %98, %99 : vector<24x24xf32>
    %cst_63 = arith.constant 5.000000e-01 : f32
    %101 = vector.broadcast %cst_63 : f32 to vector<24x24xf32>
    %102 = arith.cmpf ogt, %4, %101 : vector<24x24xf32>
    %cst_64 = arith.constant -1.000000e+30 : f32
    %103 = vector.broadcast %cst_64 : f32 to vector<24x24xf32>
    %104 = arith.select %102, %103, %100 : vector<24x24xi1>, vector<24x24xf32>
    %cst_65 = arith.constant dense<0xFF800000> : vector<24xf32>
    %105 = vector.multi_reduction <maximumf>, %104, %cst_65 [1] : vector<24x24xf32> to vector<24xf32>
    %106 = vector.shape_cast %105 : vector<24xf32> to vector<24x1xf32>
    %107 = vector.broadcast %106 : vector<24x1xf32> to vector<24x24xf32>
    %108 = arith.subf %104, %107 : vector<24x24xf32>
    %109 = math.exp %108 : vector<24x24xf32>
    %cst_66 = arith.constant dense<0.000000e+00> : vector<24xf32>
    %110 = vector.multi_reduction <add>, %109, %cst_66 [1] : vector<24x24xf32> to vector<24xf32>
    %111 = vector.shape_cast %110 : vector<24xf32> to vector<24x1xf32>
    %112 = tpu.reciprocal %111 {approx = true} : vector<24x1xf32> -> vector<24x1xf32>
    %113 = vector.broadcast %112 : vector<24x1xf32> to vector<24x24xf32>
    %114 = arith.mulf %109, %113 : vector<24x24xf32>
    %cst_67 = arith.constant dense<0.000000e+00> : vector<24x8xf32>
    %115 = tpu.matmul %114, %97, %cst_67 {dimension_numbers = #tpu.dot_dimension_numbers<[1], [0], [0], [1], [0, 0, 1, 1], [], []>} : vector<24x24xf32>, vector<24x8xf32>, vector<24x8xf32> -> vector<24x8xf32>
    %116 = tpu.concatenate %52, %73, %94, %115 in 1 : vector<24x8xf32>, vector<24x8xf32>, vector<24x8xf32>, vector<24x8xf32> -> vector<24x32xf32>
    %cst_68 = arith.constant dense<0.000000e+00> : vector<24x32xf32>
    %117 = tpu.matmul %116, %10, %cst_68 {dimension_numbers = #tpu.dot_dimension_numbers<[1], [0], [0], [1], [0, 0, 1, 1], [], []>} : vector<24x32xf32>, vector<32x32xf32>, vector<24x32xf32> -> vector<24x32xf32>
    %118 = vector.broadcast %12 : vector<1x32xf32> to vector<24x32xf32>
    %119 = arith.addf %117, %118 : vector<24x32xf32>
    %120 = arith.addf %3, %119 : vector<24x32xf32>
    %cst_69 = arith.constant dense<0.000000e+00> : vector<24xf32>
    %121 = vector.multi_reduction <add>, %120, %cst_69 [1] : vector<24x32xf32> to vector<24xf32>
    %122 = vector.shape_cast %121 : vector<24xf32> to vector<24x1xf32>
    %cst_70 = arith.constant 3.200000e+01 : f32
    %123 = vector.broadcast %cst_70 : f32 to vector<24x1xf32>
    %124 = arith.divf %122, %123 : vector<24x1xf32>
    %125 = vector.broadcast %124 : vector<24x1xf32> to vector<24x32xf32>
    %126 = arith.subf %120, %125 : vector<24x32xf32>
    %127 = arith.mulf %126, %126 : vector<24x32xf32>
    %cst_71 = arith.constant dense<0.000000e+00> : vector<24xf32>
    %128 = vector.multi_reduction <add>, %127, %cst_71 [1] : vector<24x32xf32> to vector<24xf32>
    %129 = vector.shape_cast %128 : vector<24xf32> to vector<24x1xf32>
    %cst_72 = arith.constant 3.200000e+01 : f32
    %130 = vector.broadcast %cst_72 : f32 to vector<24x1xf32>
    %131 = arith.divf %129, %130 : vector<24x1xf32>
    %cst_73 = arith.constant 9.99999974E-6 : f32
    %132 = vector.broadcast %cst_73 : f32 to vector<24x1xf32>
    %133 = arith.addf %131, %132 : vector<24x1xf32>
    %134 = math.rsqrt %133 : vector<24x1xf32>
    %135 = vector.broadcast %134 : vector<24x1xf32> to vector<24x32xf32>
    %136 = arith.mulf %126, %135 : vector<24x32xf32>
    %137 = vector.broadcast %22 : vector<1x32xf32> to vector<24x32xf32>
    %138 = arith.mulf %136, %137 : vector<24x32xf32>
    %139 = vector.broadcast %24 : vector<1x32xf32> to vector<24x32xf32>
    %140 = arith.addf %138, %139 : vector<24x32xf32>
    %cst_74 = arith.constant dense<0.000000e+00> : vector<24x128xf32>
    %141 = tpu.matmul %140, %14, %cst_74 {dimension_numbers = #tpu.dot_dimension_numbers<[1], [0], [0], [1], [0, 0, 1, 1], [], []>} : vector<24x32xf32>, vector<32x128xf32>, vector<24x128xf32> -> vector<24x128xf32>
    %142 = vector.broadcast %16 : vector<1x128xf32> to vector<24x128xf32>
    %143 = arith.addf %141, %142 : vector<24x128xf32>
    %cst_75 = arith.constant 5.000000e-01 : f32
    %144 = vector.broadcast %cst_75 : f32 to vector<24x128xf32>
    %145 = arith.mulf %144, %143 : vector<24x128xf32>
    %cst_76 = arith.constant 4.471500e-02 : f32
    %146 = vector.broadcast %cst_76 : f32 to vector<24x128xf32>
    %147 = arith.mulf %146, %143 : vector<24x128xf32>
    %148 = arith.mulf %147, %143 : vector<24x128xf32>
    %149 = arith.mulf %148, %143 : vector<24x128xf32>
    %150 = arith.addf %143, %149 : vector<24x128xf32>
    %cst_77 = arith.constant 0.797884583 : f32
    %151 = vector.broadcast %cst_77 : f32 to vector<24x128xf32>
    %152 = arith.mulf %151, %150 : vector<24x128xf32>
    %153 = math.tanh %152 : vector<24x128xf32>
    %cst_78 = arith.constant 1.000000e+00 : f32
    %154 = vector.broadcast %cst_78 : f32 to vector<24x128xf32>
    %155 = arith.addf %154, %153 : vector<24x128xf32>
    %156 = arith.mulf %145, %155 : vector<24x128xf32>
    %cst_79 = arith.constant dense<0.000000e+00> : vector<24x32xf32>
    %157 = tpu.matmul %156, %18, %cst_79 {dimension_numbers = #tpu.dot_dimension_numbers<[1], [0], [0], [1], [0, 0, 1, 1], [], []>} : vector<24x128xf32>, vector<128x32xf32>, vector<24x32xf32> -> vector<24x32xf32>
    %158 = vector.broadcast %20 : vector<1x32xf32> to vector<24x32xf32>
    %159 = arith.addf %157, %158 : vector<24x32xf32>
    %160 = arith.addf %140, %159 : vector<24x32xf32>
    %cst_80 = arith.constant dense<0.000000e+00> : vector<24xf32>
    %161 = vector.multi_reduction <add>, %160, %cst_80 [1] : vector<24x32xf32> to vector<24xf32>
    %162 = vector.shape_cast %161 : vector<24xf32> to vector<24x1xf32>
    %cst_81 = arith.constant 3.200000e+01 : f32
    %163 = vector.broadcast %cst_81 : f32 to vector<24x1xf32>
    %164 = arith.divf %162, %163 : vector<24x1xf32>
    %165 = vector.broadcast %164 : vector<24x1xf32> to vector<24x32xf32>
    %166 = arith.subf %160, %165 : vector<24x32xf32>
    %167 = arith.mulf %166, %166 : vector<24x32xf32>
    %cst_82 = arith.constant dense<0.000000e+00> : vector<24xf32>
    %168 = vector.multi_reduction <add>, %167, %cst_82 [1] : vector<24x32xf32> to vector<24xf32>
    %169 = vector.shape_cast %168 : vector<24xf32> to vector<24x1xf32>
    %cst_83 = arith.constant 3.200000e+01 : f32
    %170 = vector.broadcast %cst_83 : f32 to vector<24x1xf32>
    %171 = arith.divf %169, %170 : vector<24x1xf32>
    %cst_84 = arith.constant 9.99999974E-6 : f32
    %172 = vector.broadcast %cst_84 : f32 to vector<24x1xf32>
    %173 = arith.addf %171, %172 : vector<24x1xf32>
    %174 = math.rsqrt %173 : vector<24x1xf32>
    %175 = vector.broadcast %174 : vector<24x1xf32> to vector<24x32xf32>
    %176 = arith.mulf %166, %175 : vector<24x32xf32>
    %177 = vector.broadcast %26 : vector<1x32xf32> to vector<24x32xf32>
    %178 = arith.mulf %176, %177 : vector<24x32xf32>
    %179 = vector.broadcast %28 : vector<1x32xf32> to vector<24x32xf32>
    %180 = arith.addf %178, %179 : vector<24x32xf32>
    %c0_85 = arith.constant 0 : index
    %c0_86 = arith.constant 0 : index
    %181 = vector.load %arg22[%c0_85, %c0_86] : memref<24x32xf32, #tpu.memory_space<vmem>>, vector<24x32xf32>
    tpu.vector_store %arg22[%c0_85, %c0_86], %180 {strides = array<i32>} : memref<24x32xf32, #tpu.memory_space<vmem>>, vector<24x32xf32>,
    %c1_i32 = arith.constant 1 : i32
    %182 = arith.cmpi eq, %arg0, %c1_i32 : i32
    %183 = arith.extui %182 : i1 to i32
    %c0_i32_87 = arith.constant 0 : i32
    %184 = arith.cmpi ne, %183, %c0_i32_87 : i32
    scf.if %184 {
      %c0_88 = arith.constant 0 : index
      %c0_89 = arith.constant 0 : index
      %185 = vector.load %arg22[%c0_88, %c0_89] : memref<24x32xf32, #tpu.memory_space<vmem>>, vector<24x32xf32>
      %c0_90 = arith.constant 0 : index
      %c0_91 = arith.constant 0 : index
      %186 = vector.load %arg21[%c0_90, %c0_91] : memref<24x32xf32, #tpu.memory_space<vmem>>, vector<24x32xf32>
      tpu.vector_store %arg21[%c0_90, %c0_91], %185 {strides = array<i32>} : memref<24x32xf32, #tpu.memory_space<vmem>>, vector<24x32xf32>,
    } else {
    }
    return
  }
  func.func @transform_0(%arg0: i32) -> (i32, i32) {
    %c0_i32 = arith.constant 0 : i32
    %c0_i32_0 = arith.constant 0 : i32
    %c0_i32_1 = arith.constant 0 : i32
    return %c0_i32, %c0_i32_0 : i32, i32
  }
  func.func @transform_1(%arg0: i32) -> (i32, i32) {
    %c0_i32 = arith.constant 0 : i32
    %c0_i32_0 = arith.constant 0 : i32
    %c0_i32_1 = arith.constant 0 : i32
    return %c0_i32, %c0_i32_0 : i32, i32
  }
  func.func @transform_2(%arg0: i32) -> (i32, i32) {
    %c0_i32 = arith.constant 0 : i32
    %c0_i32_0 = arith.constant 0 : i32
    %c0_i32_1 = arith.constant 0 : i32
    return %c0_i32, %c0_i32_0 : i32, i32
  }
  func.func @transform_3(%arg0: i32) -> (i32, i32) {
    %c0_i32 = arith.constant 0 : i32
    %c0_i32_0 = arith.constant 0 : i32
    %c0_i32_1 = arith.constant 0 : i32
    return %c0_i32, %c0_i32_0 : i32, i32
  }
  func.func @transform_4(%arg0: i32) -> (i32, i32) {
    %c0_i32 = arith.constant 0 : i32
    %c0_i32_0 = arith.constant 0 : i32
    %c0_i32_1 = arith.constant 0 : i32
    return %c0_i32, %c0_i32_0 : i32, i32
  }
  func.func @transform_5(%arg0: i32) -> (i32, i32) {
    %c0_i32 = arith.constant 0 : i32
    %c0_i32_0 = arith.constant 0 : i32
    %c0_i32_1 = arith.constant 0 : i32
    return %c0_i32, %c0_i32_0 : i32, i32
  }
  func.func @transform_6(%arg0: i32) -> (i32, i32) {
    %c0_i32 = arith.constant 0 : i32
    %c0_i32_0 = arith.constant 0 : i32
    %c0_i32_1 = arith.constant 0 : i32
    return %c0_i32, %c0_i32_0 : i32, i32
  }
  func.func @transform_7(%arg0: i32) -> (i32, i32) {
    %c0_i32 = arith.constant 0 : i32
    %c0_i32_0 = arith.constant 0 : i32
    %c0_i32_1 = arith.constant 0 : i32
    return %c0_i32, %c0_i32_0 : i32, i32
  }
  func.func @transform_8(%arg0: i32) -> (i32, i32, i32) {
    %c0_i32 = arith.constant 0 : i32
    %c0_i32_0 = arith.constant 0 : i32
    %c0_i32_1 = arith.constant 0 : i32
    return %arg0, %c0_i32, %c0_i32_0 : i32, i32, i32
  }
  func.func @transform_9(%arg0: i32) -> (i32, i32, i32) {
    %c0_i32 = arith.constant 0 : i32
    %c0_i32_0 = arith.constant 0 : i32
    %c0_i32_1 = arith.constant 0 : i32
    return %arg0, %c0_i32, %c0_i32_0 : i32, i32, i32
  }
  func.func @transform_10(%arg0: i32) -> (i32, i32, i32) {
    %c0_i32 = arith.constant 0 : i32
    %c0_i32_0 = arith.constant 0 : i32
    %c0_i32_1 = arith.constant 0 : i32
    return %arg0, %c0_i32, %c0_i32_0 : i32, i32, i32
  }
  func.func @transform_11(%arg0: i32) -> (i32, i32, i32) {
    %c0_i32 = arith.constant 0 : i32
    %c0_i32_0 = arith.constant 0 : i32
    %c0_i32_1 = arith.constant 0 : i32
    return %arg0, %c0_i32, %c0_i32_0 : i32, i32, i32
  }
  func.func @transform_12(%arg0: i32) -> (i32, i32, i32) {
    %c0_i32 = arith.constant 0 : i32
    %c0_i32_0 = arith.constant 0 : i32
    %c0_i32_1 = arith.constant 0 : i32
    return %arg0, %c0_i32, %c0_i32_0 : i32, i32, i32
  }
  func.func @transform_13(%arg0: i32) -> (i32, i32, i32) {
    %c0_i32 = arith.constant 0 : i32
    %c0_i32_0 = arith.constant 0 : i32
    %c0_i32_1 = arith.constant 0 : i32
    return %arg0, %c0_i32, %c0_i32_0 : i32, i32, i32
  }
  func.func @transform_14(%arg0: i32) -> (i32, i32, i32) {
    %c0_i32 = arith.constant 0 : i32
    %c0_i32_0 = arith.constant 0 : i32
    %c0_i32_1 = arith.constant 0 : i32
    return %arg0, %c0_i32, %c0_i32_0 : i32, i32, i32
  }
  func.func @transform_15(%arg0: i32) -> (i32, i32, i32) {
    %c0_i32 = arith.constant 0 : i32
    %c0_i32_0 = arith.constant 0 : i32
    %c0_i32_1 = arith.constant 0 : i32
    return %arg0, %c0_i32, %c0_i32_0 : i32, i32, i32
  }
  func.func @transform_16(%arg0: i32) -> (i32, i32, i32) {
    %c0_i32 = arith.constant 0 : i32
    %c0_i32_0 = arith.constant 0 : i32
    %c0_i32_1 = arith.constant 0 : i32
    return %arg0, %c0_i32, %c0_i32_0 : i32, i32, i32
  }
  func.func @transform_17(%arg0: i32) -> (i32, i32, i32) {
    %c0_i32 = arith.constant 0 : i32
    %c0_i32_0 = arith.constant 0 : i32
    %c0_i32_1 = arith.constant 0 : i32
    return %arg0, %c0_i32, %c0_i32_0 : i32, i32, i32
  }
  func.func @transform_18(%arg0: i32) -> (i32, i32, i32) {
    %c0_i32 = arith.constant 0 : i32
    %c0_i32_0 = arith.constant 0 : i32
    %c0_i32_1 = arith.constant 0 : i32
    return %arg0, %c0_i32, %c0_i32_0 : i32, i32, i32
  }
  func.func @transform_19(%arg0: i32) -> (i32, i32, i32) {
    %c0_i32 = arith.constant 0 : i32
    %c0_i32_0 = arith.constant 0 : i32
    %c0_i32_1 = arith.constant 0 : i32
    return %arg0, %c0_i32, %c0_i32_0 : i32, i32, i32
  }
  func.func @transform_20(%arg0: i32) -> (i32, i32) {
    %c0_i32 = arith.constant 0 : i32
    %c0_i32_0 = arith.constant 0 : i32
    %c0_i32_1 = arith.constant 0 : i32
    return %c0_i32, %c0_i32_0 : i32, i32
  }
}

</mosaic_0001>

<bundles_post_ra>
// kernel: tpu_custom_call.1
= control target key start
LH: loop header
LB: loop body
LE: loop exit
PB: predicated region body
PF: predicated region fallthrough
CT: control target
= control target key end

     0   :  { %s4301_s0 = inlined_call_operand.vmem [shape: f32[24,4], index: 0, kind: input, shape index: {}]   ;;  %s4302_s1 = inlined_call_operand.vmem [shape: f32[24,96], index: 1, kind: input, shape index: {}]   ;;  %s4303_s2 = inlined_call_operand.vmem [shape: f32[24,24], index: 2, kind: input, shape index: {}]   ;;  %s4304_s3 = inlined_call_operand.vmem [shape: f32[4,32], index: 3, kind: input, shape index: {}]   ;;  %s4305_s4 = inlined_call_operand.vmem [shape: f32[1,32], index: 4, kind: input, shape index: {}]   ;;  %s4306_s5 = inlined_call_operand.vmem [shape: f32[32,32], index: 5, kind: input, shape index: {}]   ;;  %s4307_s6 = inlined_call_operand.vmem [shape: f32[96,32], index: 6, kind: input, shape index: {}]   ;;  %s4308_s7 = inlined_call_operand.vmem [shape: f32[1,32], index: 7, kind: input, shape index: {}]   ;;  %s4309_s8 = inlined_call_operand.vmem [shape: f32[2,32,96], index: 8, kind: input, shape index: {}]   ;;  %s4310_s9 = inlined_call_operand.vmem [shape: f32[2,1,96], index: 9, kind: input, shape index: {}]   ;;  %s4311_s10 = inlined_call_operand.vmem [shape: f32[2,32,32], index: 10, kind: input, shape index: {}]   ;;  %s4312_s11 = inlined_call_operand.vmem [shape: f32[2,1,32], index: 11, kind: input, shape index: {}]   ;;  %s4313_s12 = inlined_call_operand.vmem [shape: f32[2,32,128], index: 12, kind: input, shape index: {}]   ;;  %s4314_s13 = inlined_call_operand.vmem [shape: f32[2,1,128], index: 13, kind: input, shape index: {}]   ;;  %s4315_s14 = inlined_call_operand.vmem [shape: f32[2,128,32], index: 14, kind: input, shape index: {}]   ;;  %s4316_s15 = inlined_call_operand.vmem [shape: f32[2,1,32], index: 15, kind: input, shape index: {}]   ;;  %s4317_s16 = inlined_call_operand.vmem [shape: f32[2,1,32], index: 16, kind: input, shape index: {}]   ;;  %s4318_s17 = inlined_call_operand.vmem [shape: f32[2,1,32], index: 17, kind: input, shape index: {}]   ;;  %s4319_s18 = inlined_call_operand.vmem [shape: f32[2,1,32], index: 18, kind: input, shape index: {}]   ;;  %s4320_s19 = inlined_call_operand.vmem [shape: f32[2,1,32], index: 19, kind: input, shape index: {}]   ;;  %s4321_s20 = inlined_call_operand.hbm [shape: f32[24,32], index: 20, kind: output, shape index: {}]  }
   0x1   :  { %4327 = sst [smem:[#allocation7_spill]] %s4301_s0 }
   0x2   :  { %4328 = sst [smem:[#allocation8_spill]] %s4302_s1 }
   0x3   :  { %4329 = sst [smem:[#allocation9_spill]] %s4303_s2 }
   0x4   :  { %4330 = sst [smem:[#allocation10_spill]] %s4304_s3 }
   0x5   :  { %4331 = sst [smem:[#allocation11_spill]] %s4305_s4 }
   0x6   :  { %4332 = sst [smem:[#allocation12_spill]] %s4306_s5 }
   0x7   :  { %4333 = sst [smem:[#allocation13_spill]] %s4308_s7 }
   0x8   :  { %4334 = sst [smem:[#allocation14_spill]] %s4309_s8 }
   0x9   :  { %4335 = sst [smem:[#allocation15_spill]] %s4311_s10 }
   0xa   :  { %4336 = sst [smem:[#allocation16_spill]] %s4313_s12 }
   0xb   :  { %4337 = sst [smem:[#allocation17_spill]] %s4314_s13 }
   0xc   :  { %4338 = sst [smem:[#allocation18_spill]] %s4321_s20 }
   0xd   :  { %25 = vsyncpa [#allocation4], 0  ;;  %s3587_s1 = smov 0  }
   0xe LB: > { %4339 = sst [smem:[#allocation6_spill]] %s3460_s1  ;;  %s3593_s22 = sadd.s32 4294967295, %s3460_s1   ;;  %s3460_s1 = sphi %s3587_s1, %s31_s1  }
   0xf   : > { %p2855_p0 = scmp.ge.s32.totalorder %s3460_s1, 1  ;;  %p652_p1 = scmp.lt.s32.totalorder %s3460_s1, 3 }
  0x11   : > { %p653_p2 = pnand %p2855_p0, %p652_p1 }
  0x12   : > { %p744_p3 = scmp.lt.s32.totalorder (!%p653_p2), %s3593_s22, 1  ;;  %s4340_s8 = sld [smem:[#allocation14_spill]] (!%p653_p2) }
  0x13   : > { %656 = sbr.rel (%p653_p2) target bundleno = 2944 (0xb80), region = 100  ;;  %s4341_s10 = sld [smem:[#allocation15_spill]] (!%p653_p2) }
  0x14   : > { %s4342_s12 = sld [smem:[#allocation16_spill]] (!%p653_p2)  ;;  %p2864_p4 = scmp.ne.s32.totalorder (!%p653_p2), %s3593_s22, 0 }
  0x18   : > { %s3599_s23 = scalar_select %p744_p3, %s3593_s22, 1 }
  0x19   : > { %s4344_s29 = sld [smem:[#allocation10_spill]] (!%p2864_p4) }
  0x1a   : > { %s2935_s24 = sshll.u32 %s3599_s23, 5  ;;  %s2938_s27 = sshll.u32 %s3599_s23, 7 }
  0x1b   : > { %s3609_s28 = scalar_lea.vmem %s4340_s8, %s2935_s24  ;;  %s3614_s30 = scalar_lea.vmem %s4341_s10, %s2935_s24 }
  0x1c   : > { %s3623_s5 = scalar_lea.vmem %s4342_s12, %s2935_s24  ;;  %s3633_s4 = scalar_lea.vmem %s4315_s14, %s2938_s27 }
  0x1d   : > { %s775_s0 = scalar_lea.vmem %s4316_s15, %s3599_s23  ;;  %s778_s7 = scalar_lea.vmem %s4317_s16, %s3599_s23 }
  0x1e   : > { %s781_s12 = scalar_lea.vmem %s4318_s17, %s3599_s23  ;;  %s784_s26 = scalar_lea.vmem %s4319_s18, %s3599_s23 }
  0x1f   : > { %s787_s3 = scalar_lea.vmem %s4320_s19, %s3599_s23  ;;  %791 = sbr.rel (%p2864_p4) target bundleno = 440 (0x1b8), region = 104 }
  0x20   : > { %s4345_s20 = sld [smem:[#allocation7_spill]] (!%p2864_p4) }
  0x21   : > { %s4346_s13 = sld [smem:[#allocation12_spill]] (!%p2864_p4) }
  0x22   : > { %s4347_s21 = sld [smem:[#allocation8_spill]] (!%p2864_p4) }
  0x23   : > { %s4348_s24 = sld [smem:[#allocation11_spill]] (!%p2864_p4) }
  0x24   : > { %v795_v0 = vld [vmem:[%s4344_s29] sm:$0xf]  ;;  %vm813_vm0 = vcmask 1043456   ;;  %v3462_v2 = vmov 0.0   ;;  %vm3463_vm1 = vmmov 0   ;;  %vm803_vm2 = vcmask 31744  }
  0x25   : > { %3053 = vmatprep.subr.mxu0 %v3462_v2  ;;  %3055 = vmatprep.mubr.msk.f32.mxu0 %vm3463_vm1, %v3462_v2  ;;  %v915_v3 = vld [vmem:[%s4307_s6 + $0x58] sm:$0xff]  ;;  %v914_v4 = vld [vmem:[%s4307_s6 + $0x50] sm:$0xff]  ;;  %v913_v6 = vld [vmem:[%s4307_s6 + $0x48] sm:$0xff]  ;;  %vm916_vm3 = vcmask 785408   ;;  %vm1006_vm4 = vcmask 261120   ;;  %s4349_s8 = sld [smem:[#allocation13_spill]] }
  0x26   : > { %v792_v1 = vld [vmem:[%s4345_s20] sm:$0xff]  ;;  %3054 = vmatpush3.msk.msra.mxu0 %vm813_vm0, %v795_v0  ;;  %3064 = vmatprep.subr.mxu1 %v3462_v2  ;;  %v793_v5 = vld [vmem:[%s4345_s20 + $0x8] sm:$0xff]  ;;  %v794_v10 = vld [vmem:[%s4345_s20 + $0x10] sm:$0xff] }
  0x27   : > { %3056 = vmatmul.mubr.msk.f32.vlgmr.msra.gmra.mxu0 %vm803_vm2, %v792_v1  ;;  %3065 = vmatpush3.msra.mxu1 %v915_v3  ;;  %v900_v7 = vld [vmem:[%s4346_s13 + $0x18] sm:$0xff]  ;;  %v912_v8 = vld [vmem:[%s4307_s6 + $0x40] sm:$0xff]  ;;  %v899_v9 = vld [vmem:[%s4346_s13 + $0x10] sm:$0xff] }
  0x28   : > { %3058 = vmatprep.mubr.msk.f32.mxu0 %vm3463_vm1, %v3462_v2  ;;  %3066 = vmatprep.subr.mxu1 %v3462_v2  ;;  %v911_v11 = vld [vmem:[%s4307_s6 + $0x38] sm:$0xff]  ;;  %v910_v12 = vld [vmem:[%s4307_s6 + $0x30] sm:$0xff]  ;;  %v898_v13 = vld [vmem:[%s4346_s13 + $0x8] sm:$0xff] }
  0x29   : > { %3067 = vmatpush3.msra.mxu1 %v914_v4  ;;  %3097 = vmatprep.subr.mxu0 %v3462_v2  ;;  %v909_v14 = vld [vmem:[%s4307_s6 + $0x28] sm:$0xff]  ;;  %v908_v15 = vld [vmem:[%s4307_s6 + $0x20] sm:$0xff]  ;;  %v907_v16 = vld [vmem:[%s4307_s6 + $0x18] sm:$0xff] }
  0x2a   : > { %3068 = vmatprep.subr.mxu1 %v3462_v2  ;;  %3098 = vmatpush3.msra.mxu0 %v900_v7  ;;  %v906_v17 = vld [vmem:[%s4307_s6 + $0x10] sm:$0xff]  ;;  %v905_v18 = vld [vmem:[%s4307_s6 + $0x8] sm:$0xff]  ;;  %v904_v19 = vld [vmem:[%s4307_s6] sm:$0xff] }
  0x2b   : > { %3059 = vmatmul.mubr.msk.f32.gmra.mxu0 %vm803_vm2, %v793_v5  ;;  %3069 = vmatpush3.msra.mxu1 %v913_v6  ;;  %v901_v20 = vld [vmem:[%s4347_s21] sm:$0xff]  ;;  %v902_v22 = vld [vmem:[%s4347_s21 + $0x8] sm:$0xff]  ;;  %v903_v23 = vld [vmem:[%s4347_s21 + $0x10] sm:$0xff] }
  0x2c   : > { %3061 = vmatprep.mubr.msk.f32.mxu0 %vm3463_vm1, %v3462_v2  ;;  %3070 = vmatprep.subr.mxu1 %v3462_v2  ;;  %v897_v21 = vld [vmem:[%s4346_s13] sm:$0xff] }
  0x2d   : > { %3071 = vmatpush3.msra.mxu1 %v912_v8  ;;  %3099 = vmatprep.subr.mxu0 %v3462_v2  ;;  %v2865_v24 = vld [vmem:[%s4348_s24] ss:$0 sm:$0xff] }
  0x2e   : > { %3072 = vmatprep.subr.mxu1 %v3462_v2  ;;  %3100 = vmatpush3.msra.mxu0 %v899_v9  ;;  %v2876_v41 = vld [vmem:[%s4349_s8] ss:$0 sm:$0xff] }
  0x2f   : > { %3062 = vmatmul.mubr.msk.f32.gmra.mxu0 %vm803_vm2, %v794_v10  ;;  %3073 = vmatpush3.msra.mxu1 %v911_v11 }
  0x30   : > { %3074 = vmatprep.subr.mxu1 %v3462_v2  ;;  %3101 = vmatprep.subr.mxu0 %v3462_v2 }
  0x31   : > { %3075 = vmatpush3.msra.mxu1 %v910_v12  ;;  %3102 = vmatpush3.msra.mxu0 %v898_v13 }
  0x32   : > { %3076 = vmatprep.subr.mxu1 %v3462_v2  ;;  %3103 = vmatprep.subr.mxu0 %v3462_v2 }
  0x33   : > { %3077 = vmatpush3.msra.mxu1 %v909_v14  ;;  %3088 = vmatprep.mubr.msk.f32.mxu1 %vm3463_vm1, %v3462_v2 }
  0x34   : > { %3078 = vmatprep.subr.mxu1 %v3462_v2  ;;  %3105 = vmatprep.mubr.msk.f32.mxu0 %vm3463_vm1, %v3462_v2 }
  0x35   : > { %3079 = vmatpush3.msra.mxu1 %v908_v15  ;;  %3104 = vmatpush3.msra.mxu0 %v897_v21 }
  0x36   : > { %3080 = vmatprep.subr.mxu1 %v3462_v2 }
  0x37   : > { %3081 = vmatpush3.msra.mxu1 %v907_v16 }
  0x38   : > { %3082 = vmatprep.subr.mxu1 %v3462_v2 }
  0x39   : > { %3083 = vmatpush3.msra.mxu1 %v906_v17 }
  0x3a   : > { %3084 = vmatprep.subr.mxu1 %v3462_v2 }
  0x3b   : > { %3085 = vmatpush3.msra.mxu1 %v905_v18 }
  0x3c   : > { %3086 = vmatprep.subr.mxu1 %v3462_v2 }
  0x3d   : > { %3087 = vmatpush3.msra.mxu1 %v904_v19 }
  0x3e   : > { %3089 = vmatmul.mubr.msk.f32.vlgmr.msra.gmra.mxu1 %vm916_vm3, %v901_v20 }
  0x3f   : > { %3091 = vmatprep.mubr.msk.f32.mxu1 %vm3463_vm1, %v3462_v2 }
  0x42   : > { %3092 = vmatmul.mubr.msk.f32.gmra.mxu1 %vm916_vm3, %v902_v22 }
  0x43   : > { %3094 = vmatprep.mubr.msk.f32.mxu1 %vm3463_vm1, %v3462_v2 }
  0x46   : > { %3095 = vmatmul.mubr.msk.f32.gmra.mxu1 %vm916_vm3, %v903_v23 }
  0xe7   : > { %v883_v25 = vpop.f32.mrf.mxu0 }
  0xe8   : > { %v884_v26 = vadd.f32 %v2865_v24, %v883_v25 }
  0xe9   : > { %v3057_v27 = vpop.f32.mrf.mxu0 }
  0xea   : > { %3106 = vmatmul.mubr.msk.f32.vlgmr.msra.gmra.mxu0 %vm1006_vm4, %v884_v26 }
  0xeb   : > { %v888_v28 = vpop.f32.mrf.mxu0  ;;  %3108 = vmatprep.mubr.msk.f32.mxu0 %vm3463_vm1, %v3462_v2 }
  0xec   : > { %v889_v29 = vadd.f32 %v2865_v24, %v888_v28 }
  0xed   : > { %v3060_v30 = vpop.f32.mrf.mxu0 }
  0xee   : > { %3109 = vmatmul.mubr.msk.f32.gmra.mxu0 %vm1006_vm4, %v889_v29 }
  0xef   : > { %v893_v31 = vpop.f32.mrf.mxu0  ;;  %3111 = vmatprep.mubr.msk.f32.mxu0 %vm3463_vm1, %v3462_v2 }
  0xf0   : > { %v894_v32 = vadd.f32 %v2865_v24, %v893_v31 }
  0xf1   : > { %v3063_v33 = vpop.f32.mrf.mxu0 }
  0xf2   : > { %3112 = vmatmul.mubr.msk.f32.gmra.mxu0 %vm1006_vm4, %v894_v32 }
  0xfe   : > { %v992_v34 = vpop.f32.mrf.mxu1 }
 0x100   : > { %v3090_v35 = vpop.f32.mrf.mxu1 }
 0x102   : > { %v997_v36 = vpop.f32.mrf.mxu1 }
 0x104   : > { %v3093_v37 = vpop.f32.mrf.mxu1 }
 0x106   : > { %v1002_v38 = vpop.f32.mrf.mxu1 }
 0x108   : > { %v3096_v39 = vpop.f32.mrf.mxu1 }
 0x1aa   : > { %v1082_v40 = vpop.f32.mrf.mxu0 }
 0x1ab   : > { %v1083_v42 = vadd.f32 %v1082_v40, %v992_v34 }
 0x1ac   : > { %v3107_v43 = vpop.f32.mrf.mxu0 }
 0x1ad   : > { %v1103_v44 = vadd.f32 %v2876_v41, %v1083_v42 }
 0x1ae   : > { %v1087_v45 = vpop.f32.mrf.mxu0 }
 0x1af   : > { %1106 = vst.msk [vmem:[#allocation2] sm:$0xff] %vm1006_vm4, %v1103_v44  ;;  %v1088_v46 = vadd.f32 %v1087_v45, %v997_v36 }
 0x1b0   : > { %v3110_v47 = vpop.f32.mrf.mxu0 }
 0x1b1   : > { %v1104_v48 = vadd.f32 %v2876_v41, %v1088_v46 }
 0x1b2   : > { %v1092_v49 = vpop.f32.mrf.mxu0 }
 0x1b3   : > { %1107 = vst.msk [vmem:[#allocation2 + $0x8] sm:$0xff] %vm1006_vm4, %v1104_v48  ;;  %v1093_v50 = vadd.f32 %v1092_v49, %v1002_v38 }
 0x1b4   : > { %v3113_v51 = vpop.f32.mrf.mxu0 }
 0x1b5   : > { %v1105_v52 = vadd.f32 %v2876_v41, %v1093_v50 }
 0x1b7   : > { %1108 = vst.msk [vmem:[#allocation2 + $0x10] sm:$0xff] %vm1006_vm4, %v1105_v52 }
 0x1b8 PF: > { %v1118_v53 = vld [vmem:[%s3609_s28 + $0x18] sm:$0xff]  ;;  %v3464_v54 = vmov 0.0   ;;  %v1117_v55 = vld [vmem:[%s3609_s28 + $0x10] sm:$0xff]  ;;  %vm3465_vm5 = vmmov 0   ;;  %v1116_v56 = vld [vmem:[%s3609_s28 + $0x8] sm:$0xff]  ;;  %vm1157_vm6 = vcmask 261120   ;;  %s4350_s27 = scalar_lea.vmem %s4310_s9, %s3599_s23 }
 0x1b9   : > { %3114 = vmatprep.subr.mxu0 %v3464_v54  ;;  %3122 = vmatprep.mubr.msk.f32.mxu0 %vm3465_vm5, %v3464_v54  ;;  %v1115_v57 = vld [vmem:[%s3609_s28] sm:$0xff]  ;;  %s3466_s29 = smov 96   ;;  %s3467_s1 = smov 88   ;;  %vm1256_vm7 = vcmask 64512   ;;  %vm1358_vm9 = vcmask 195584   ;;  %vm2252_vm12 = vcmask 130048  }
 0x1ba   : > { %3115 = vmatpush3.msra.mxu0 %v1118_v53  ;;  %3161 = vmatprep.subr.mxu1 %v3464_v54  ;;  %v3787_v58 = vld [vmem:[#allocation2] sm:$0xff]  ;;  %v3795_v59 = vld [vmem:[#allocation2 + $0x8] sm:$0xff]  ;;  %s3468_s24 = smov 80   ;;  %s3469_s2 = smov 120  }
 0x1bb   : > { %3116 = vmatprep.subr.mxu0 %v3464_v54  ;;  %3167 = vmatprep.mubr.msk.f32.mxu1 %vm3465_vm5, %v3464_v54  ;;  %v2877_v61 = vld [vmem:[%s4350_s27] ss:$0 sm:$0xff]  ;;  %s3470_s25 = smov 72   ;;  %s3471_s8 = smov 112  }
 0x1bc   : > { %3117 = vmatpush3.msra.mxu0 %v1117_v55  ;;  %s3472_s28 = smov 104   ;;  %s3473_s10 = smov 64  }
 0x1bd   : > { %3118 = vmatprep.subr.mxu0 %v3464_v54  ;;  %s3474_s27 = smov 56   ;;  %p2930_p5 = scmp.ne.s32.totalorder %s3593_s22, 1 }
 0x1be   : > { %3119 = vmatpush3.msra.mxu0 %v1116_v56  ;;  %v3801_v60 = vld [vmem:[#allocation2 + $0x10] sm:$0xff] }
 0x1bf   : > { %3120 = vmatprep.subr.mxu0 %v3464_v54 }
 0x1c0   : > { %3121 = vmatpush3.msra.mxu0 %v1115_v57 }
 0x1c1   : > { %3123 = vmatmul.mubr.msk.f32.vlgmr.msra.gmra.mxu0 %vm1157_vm6, %v3787_v58  ;;  %3131 = vmatprep.subr.mxu0 %v3464_v54 }
 0x1c2   : > { %3125 = vmatprep.mubr.msk.f32.mxu0 %vm3465_vm5, %v3464_v54 }
 0x1c5   : > { %3126 = vmatmul.mubr.msk.f32.gmra.mxu0 %vm1157_vm6, %v3795_v59 }
 0x1c6   : > { %3128 = vmatprep.mubr.msk.f32.mxu0 %vm3465_vm5, %v3464_v54 }
 0x1c9   : > { %3129 = vmatmul.mubr.msk.f32.gmra.mxu0 %vm1157_vm6, %v3801_v60 }
 0x1ca   : > { %3137 = vmatprep.mubr.msk.f32.mxu0 %vm3465_vm5, %v3464_v54 }
 0x281   : > { %v1233_v62 = vpop.f32.mrf.mxu0 }
 0x282   : > { %v3812_v63 = vadd.f32 %v2877_v61, %v1233_v62 }
 0x283   : > { %v3124_v0 = vpop.f32.mrf.mxu0 }
 0x284   : > { %1250 = vrot.lane.b32.xlu1 %v3812_v63, %s3466_s29 }
 0x285   : > { %v1238_v1 = vpop.f32.mrf.mxu0 }
 0x286   : > { %v3819_v6 = vadd.f32 %v2877_v61, %v1238_v1 }
 0x287   : > { %v3127_v2 = vpop.f32.mrf.mxu0 }
 0x289   : > { %v1243_v3 = vpop.f32.mrf.mxu0 }
 0x28a   : > { %v3815_v4 = vadd.f32 %v2877_v61, %v1243_v3 }
 0x28b   : > { %v3130_v5 = vpop.f32.mrf.mxu0 }
 0x28c   : > { %1500 = vrot.lane.b32.xlu1 %v3815_v4, %s3467_s1  ;;  %1254 = vrot.lane.b32.xlu0 %v3815_v4, %s3466_s29 }
 0x290   : > { %1496 = vrot.lane.b32.xlu1 %v3812_v63, %s3467_s1  ;;  %1252 = vrot.lane.b32.xlu0 %v3819_v6, %s3466_s29  ;;  %s3477_s29 = smov 8  }
 0x294   : > { %1741 = vrot.lane.b32.xlu1 %v3815_v4, %s3468_s24  ;;  %1498 = vrot.lane.b32.xlu0 %v3819_v6, %s3467_s1  ;;  %s3478_s1 = smov 16  }
 0x298   : > { %1739 = vrot.lane.b32.xlu1 %v3819_v6, %s3468_s24  ;;  %1490 = vrot.lane.b32.xlu0 %v3812_v63, %s3469_s2 }
 0x29c   : > { %1737 = vrot.lane.b32.xlu1 %v3812_v63, %s3468_s24  ;;  %1492 = vrot.lane.b32.xlu0 %v3819_v6, %s3469_s2  ;;  %s4351_s24 = sld [smem:[#allocation9_spill]] }
 0x2a0   : > { %1982 = vrot.lane.b32.xlu1 %v3815_v4, %s3470_s25  ;;  %1494 = vrot.lane.b32.xlu0 %v3815_v4, %s3469_s2  ;;  %s3479_s2 = smov 24  }
 0x2a2   : > { %v3916_v32 = vld [vmem:[%s4351_s24] sm:$0xff]  ;;  %v3922_v35 = vld [vmem:[%s4351_s24 + $0x8] sm:$0xff]  ;;  %v1114_v47 = vld [vmem:[%s4351_s24 + $0x10] sm:$0xff] }
 0x2a3   : > { %vm1352_vm8 = vcmp.gt.f32.partialorder %v3916_v32, 0.5  ;;  %vm1353_vm10 = vcmp.gt.f32.partialorder %v3922_v35, 0.5  ;;  %vm1354_vm11 = vcmp.gt.f32.partialorder %v1114_v47, 0.5 }
 0x2a4   : > { %1980 = vrot.lane.b32.xlu1 %v3819_v6, %s3470_s25  ;;  %1731 = vrot.lane.b32.xlu0 %v3812_v63, %s3471_s8 }
 0x2a8   : > { %1978 = vrot.lane.b32.xlu1 %v3812_v63, %s3470_s25  ;;  %1733 = vrot.lane.b32.xlu0 %v3819_v6, %s3471_s8 }
 0x2ac   : > { %1974 = vrot.lane.b32.xlu1 %v3819_v6, %s3472_s28  ;;  %1735 = vrot.lane.b32.xlu0 %v3815_v4, %s3471_s8  ;;  %s4352_s8 = scalar_lea.vmem %s4312_s11, %s3599_s23 }
 0x2b0   : > { %1394 = vrot.lane.b32.xlu1 %v3819_v6, %s3473_s10  ;;  %1972 = vrot.lane.b32.xlu0 %v3812_v63, %s3472_s28 }
 0x2b4   : > { %1635 = vrot.lane.b32.xlu1 %v3819_v6, %s3474_s27  ;;  %1976 = vrot.lane.b32.xlu0 %v3815_v4, %s3472_s28 }
 0x2b8   : > { %1392 = vrot.lane.b32.xlu0 %v3812_v63, %s3473_s10 }
 0x2bc   : > { %1633 = vrot.lane.b32.xlu0 %v3812_v63, %s3474_s27 }
 0x2c0   : > { %1396 = vrot.lane.b32.xlu0 %v3815_v4, %s3473_s10  ;;  %s3475_s10 = smov 48  }
 0x2c4   : > { %1637 = vrot.lane.b32.xlu0 %v3815_v4, %s3474_s27  ;;  %s3476_s27 = smov 40  }
 0x2f6   : > { %v1251_v7 = vpop.permute.xlu1 %1250 }
 0x2fe   : > { %v1501_v8 = vpop.permute.xlu1 %1500  ;;  %v1255_v9 = vpop.permute.xlu0 %1254 }
 0x2ff   : > { %3132 = vmatpush3.xpose.msk.msra.mxu0 %vm1256_vm7, %v1255_v9  ;;  %3162 = vmatpush3.xpose.msk.msra.mxu1 %vm1256_vm7, %v1501_v8 }
 0x300   : > { %3133 = vmatprep.subr.mxu0 %v3464_v54  ;;  %3163 = vmatprep.subr.mxu1 %v3464_v54 }
 0x302   : > { %v1497_v10 = vpop.permute.xlu1 %1496  ;;  %v1253_v11 = vpop.permute.xlu0 %1252 }
 0x303   : > { %3134 = vmatpush3.xpose.msk.msra.mxu0 %vm1256_vm7, %v1253_v11 }
 0x304   : > { %3135 = vmatprep.subr.mxu0 %v3464_v54 }
 0x306   : > { %v1742_v12 = vpop.permute.xlu1 %1741  ;;  %v1499_v13 = vpop.permute.xlu0 %1498 }
 0x307   : > { %3136 = vmatpush3.xpose.msk.msra.mxu0 %vm1256_vm7, %v1251_v7  ;;  %3164 = vmatpush3.xpose.msk.msra.mxu1 %vm1256_vm7, %v1499_v13 }
 0x308   : > { %3165 = vmatprep.subr.mxu1 %v3464_v54  ;;  %3146 = vmatprep.subr.mxu0 %v3464_v54 }
 0x30a   : > { %v1740_v14 = vpop.permute.xlu1 %1739  ;;  %3138 = vmatmul.mubr.msk.f32.vlgmr.msra.gmra.mxu0 %vm1256_vm7, %v3812_v63  ;;  %v1491_v15 = vpop.permute.xlu0 %1490 }
 0x30b   : > { %3166 = vmatpush3.xpose.msk.msra.mxu1 %vm1256_vm7, %v1497_v10  ;;  %3140 = vmatprep.mubr.msk.f32.mxu0 %vm3465_vm5, %v3464_v54 }
 0x30c   : > { %3191 = vmatprep.subr.mxu1 %v3464_v54 }
 0x30e   : > { %3141 = vmatmul.mubr.msk.f32.gmra.mxu0 %vm1256_vm7, %v3819_v6  ;;  %3168 = vmatmul.mubr.msk.f32.vlgmr.msra.gmra.mxu1 %vm1256_vm7, %v1491_v15  ;;  %v1493_v16 = vpop.permute.xlu0 %1492  ;;  %v1738_v17 = vpop.permute.xlu1 %1737 }
 0x30f   : > { %3192 = vmatpush3.xpose.msk.msra.mxu1 %vm1256_vm7, %v1742_v12  ;;  %3143 = vmatprep.mubr.msk.f32.mxu0 %vm3465_vm5, %v3464_v54 }
 0x310   : > { %3170 = vmatprep.mubr.msk.f32.mxu1 %vm3465_vm5, %v3464_v54  ;;  %3193 = vmatprep.subr.mxu1 %v3464_v54 }
 0x312   : > { %3144 = vmatmul.mubr.msk.f32.gmra.mxu0 %vm1256_vm7, %v3815_v4  ;;  %3171 = vmatmul.mubr.msk.f32.gmra.mxu1 %vm1256_vm7, %v1493_v16  ;;  %v1495_v18 = vpop.permute.xlu0 %1494  ;;  %v1983_v19 = vpop.permute.xlu1 %1982 }
 0x313   : > { %3194 = vmatpush3.xpose.msk.msra.mxu1 %vm1256_vm7, %v1740_v14  ;;  %3173 = vmatprep.mubr.msk.f32.mxu1 %vm3465_vm5, %v3464_v54 }
 0x314   : > { %3195 = vmatprep.subr.mxu1 %v3464_v54  ;;  %3152 = vmatprep.mubr.msk.f32.mxu0 %vm3465_vm5, %v3464_v54 }
 0x316   : > { %3174 = vmatmul.mubr.msk.f32.gmra.mxu1 %vm1256_vm7, %v1495_v18  ;;  %v1732_v20 = vpop.permute.xlu0 %1731  ;;  %v1981_v22 = vpop.permute.xlu1 %1980 }
 0x317   : > { %3196 = vmatpush3.xpose.msk.msra.mxu1 %vm1256_vm7, %v1738_v17  ;;  %3197 = vmatprep.mubr.msk.f32.mxu1 %vm3465_vm5, %v3464_v54 }
 0x318   : > { %3221 = vmatprep.subr.mxu1 %v3464_v54 }
 0x31a   : > { %3198 = vmatmul.mubr.msk.f32.vlgmr.msra.gmra.mxu1 %vm1256_vm7, %v1732_v20  ;;  %v1734_v21 = vpop.permute.xlu0 %1733  ;;  %v1979_v24 = vpop.permute.xlu1 %1978 }
 0x31b   : > { %3222 = vmatpush3.xpose.msk.msra.mxu1 %vm1256_vm7, %v1983_v19  ;;  %3200 = vmatprep.mubr.msk.f32.mxu1 %vm3465_vm5, %v3464_v54 }
 0x31c   : > { %3223 = vmatprep.subr.mxu1 %v3464_v54 }
 0x31e   : > { %3201 = vmatmul.mubr.msk.f32.gmra.mxu1 %vm1256_vm7, %v1734_v21  ;;  %v1736_v23 = vpop.permute.xlu0 %1735  ;;  %v1975_v27 = vpop.permute.xlu1 %1974 }
 0x31f   : > { %3224 = vmatpush3.xpose.msk.msra.mxu1 %vm1256_vm7, %v1981_v22  ;;  %3203 = vmatprep.mubr.msk.f32.mxu1 %vm3465_vm5, %v3464_v54 }
 0x320   : > { %3225 = vmatprep.subr.mxu1 %v3464_v54 }
 0x322   : > { %3204 = vmatmul.mubr.msk.f32.gmra.mxu1 %vm1256_vm7, %v1736_v23  ;;  %v1973_v25 = vpop.permute.xlu0 %1972  ;;  %v1395_v31 = vpop.permute.xlu1 %1394 }
 0x323   : > { %3226 = vmatpush3.xpose.msk.msra.mxu1 %vm1256_vm7, %v1979_v24  ;;  %3227 = vmatprep.mubr.msk.f32.mxu1 %vm3465_vm5, %v3464_v54 }
 0x324   : > { %3251 = vmatprep.subr.mxu1 %v3464_v54 }
 0x326   : > { %3228 = vmatmul.mubr.msk.f32.vlgmr.msra.gmra.mxu1 %vm1256_vm7, %v1973_v25  ;;  %v1977_v26 = vpop.permute.xlu0 %1976 }
 0x327   : > { %3230 = vmatprep.mubr.msk.f32.mxu1 %vm3465_vm5, %v3464_v54 }
 0x32a   : > { %3231 = vmatmul.mubr.msk.f32.gmra.mxu1 %vm1256_vm7, %v1975_v27  ;;  %v1393_v28 = vpop.permute.xlu0 %1392 }
 0x32b   : > { %3233 = vmatprep.mubr.msk.f32.mxu1 %vm3465_vm5, %v3464_v54 }
 0x32e   : > { %3234 = vmatmul.mubr.msk.f32.gmra.mxu1 %vm1256_vm7, %v1977_v26  ;;  %v3906_v29 = vpop.permute.xlu0 %1633 }
 0x32f   : > { %3259 = vmatprep.mubr.msk.f32.mxu1 %vm3465_vm5, %v3464_v54 }
 0x332   : > { %v1397_v30 = vpop.permute.xlu0 %1396 }
 0x333   : > { %3147 = vmatpush3.msra.mxu0 %v1397_v30 }
 0x334   : > { %3148 = vmatprep.subr.mxu0 %v3464_v54 }
 0x335   : > { %3149 = vmatpush3.msra.mxu0 %v1395_v31 }
 0x336   : > { %3150 = vmatprep.subr.mxu0 %v3464_v54 }
 0x337   : > { %3151 = vmatpush3.msra.mxu0 %v1393_v28 }
 0x338   : > { %3176 = vmatprep.subr.mxu0 %v3464_v54 }
 0x3ca   : > { %v1335_v33 = vpop.f32.mrf.mxu0 }
 0x3cb   : > { %v1349_v34 = vmul.f32 0.35355338, %v1335_v33 }
 0x3cc   : > { %v3139_v36 = vpop.f32.mrf.mxu0 }
 0x3cd   : > { %v3926_v37 = vsel %vm1352_vm8, -1e+30, %v1349_v34 }
 0x3ce   : > { %v1340_v38 = vpop.f32.mrf.mxu0  ;;  %v1580_v39 = vpop.f32.mrf.mxu1  ;;  %v1359_v40 = vsel %vm1358_vm9, %v3926_v37, -inf }
 0x3cf   : > { %v1350_v41 = vmul.f32 0.35355338, %v1340_v38  ;;  %v1594_v42 = vmul.f32 0.35355338, %v1580_v39  ;;  %1360 = vmax.xlane.f32.xlu1 %v1359_v40  ;;  %v4000_v40 = vpop.permute.xlu1 %1635 }
 0x3d0   : > { %v3142_v43 = vpop.f32.mrf.mxu0  ;;  %v3169_v44 = vpop.f32.mrf.mxu1 }
 0x3d1   : > { %v3933_v45 = vsel %vm1352_vm8, -1e+30, %v1594_v42  ;;  %v3937_v46 = vsel %vm1353_vm10, -1e+30, %v1350_v41  ;;  %v4002_v41 = vpop.permute.xlu0 %1637 }
 0x3d2   : > { %v1345_v48 = vpop.f32.mrf.mxu0  ;;  %v1585_v49 = vpop.f32.mrf.mxu1  ;;  %v1600_v50 = vsel %vm1358_vm9, %v3933_v45, -inf  ;;  %v1362_v51 = vsel %vm1358_vm9, %v3937_v46, -inf }
 0x3d3   : > { %v1351_v52 = vmul.f32 0.35355338, %v1345_v48  ;;  %v1595_v53 = vmul.f32 0.35355338, %v1585_v49  ;;  %1601 = vmax.xlane.f32.xlu1 %v1600_v50  ;;  %1363 = vmax.xlane.f32.xlu0 %v1362_v51 }
 0x3d4   : > { %v3145_v55 = vpop.f32.mrf.mxu0  ;;  %v3172_v56 = vpop.f32.mrf.mxu1 }
 0x3d5   : > { %v3948_v57 = vsel %vm1353_vm10, -1e+30, %v1595_v53  ;;  %v3953_v1 = vsel %vm1354_vm11, -1e+30, %v1351_v52 }
 0x3d6   : > { %v1590_v61 = vpop.f32.mrf.mxu1  ;;  %v1603_v62 = vsel %vm1358_vm9, %v3948_v57, -inf  ;;  %v1365_v8 = vsel %vm1358_vm9, %v3953_v1, -inf }
 0x3d7   : > { %v1596_v0 = vmul.f32 0.35355338, %v1590_v61  ;;  %1604 = vmax.xlane.f32.xlu0 %v1603_v62 }
 0x3d8   : > { %v3175_v2 = vpop.f32.mrf.mxu1 }
 0x3d9   : > { %v3956_v3 = vsel %vm1354_vm11, -1e+30, %v1596_v0 }
 0x3da   : > { %v1821_v5 = vpop.f32.mrf.mxu1  ;;  %v1606_v7 = vsel %vm1358_vm9, %v3956_v3, -inf }
 0x3db   : > { %v1835_v9 = vmul.f32 0.35355338, %v1821_v5  ;;  %1607 = vmax.xlane.f32.xlu1 %v1606_v7  ;;  %1366 = vmax.xlane.f32.xlu0 %v1365_v8 }
 0x3dc   : > { %v3199_v10 = vpop.f32.mrf.mxu1 }
 0x3dd   : > { %v3964_v11 = vsel %vm1352_vm8, -1e+30, %v1835_v9 }
 0x3de   : > { %v1826_v12 = vpop.f32.mrf.mxu1  ;;  %v1841_v13 = vsel %vm1358_vm9, %v3964_v11, -inf }
 0x3df   : > { %v1836_v14 = vmul.f32 0.35355338, %v1826_v12  ;;  %1842 = vmax.xlane.f32.xlu0 %v1841_v13 }
 0x3e0   : > { %v3202_v15 = vpop.f32.mrf.mxu1 }
 0x3e1   : > { %v3970_v16 = vsel %vm1353_vm10, -1e+30, %v1836_v14 }
 0x3e2   : > { %v1831_v17 = vpop.f32.mrf.mxu1  ;;  %v1844_v18 = vsel %vm1358_vm9, %v3970_v16, -inf }
 0x3e3   : > { %v1837_v19 = vmul.f32 0.35355338, %v1831_v17  ;;  %1845 = vmax.xlane.f32.xlu1 %v1844_v18 }
 0x3e4   : > { %v3205_v20 = vpop.f32.mrf.mxu1 }
 0x3e5   : > { %v3975_v21 = vsel %vm1354_vm11, -1e+30, %v1837_v19 }
 0x3e6   : > { %v2062_v22 = vpop.f32.mrf.mxu1  ;;  %v1847_v23 = vsel %vm1358_vm9, %v3975_v21, -inf }
 0x3e7   : > { %v2076_v24 = vmul.f32 0.35355338, %v2062_v22  ;;  %1848 = vmax.xlane.f32.xlu0 %v1847_v23 }
 0x3e8   : > { %v3229_v25 = vpop.f32.mrf.mxu1 }
 0x3e9   : > { %v3981_v26 = vsel %vm1352_vm8, -1e+30, %v2076_v24 }
 0x3ea   : > { %v2067_v27 = vpop.f32.mrf.mxu1  ;;  %v2082_v28 = vsel %vm1358_vm9, %v3981_v26, -inf }
 0x3eb   : > { %v2077_v30 = vmul.f32 0.35355338, %v2067_v27  ;;  %2083 = vmax.xlane.f32.xlu1 %v2082_v28 }
 0x3ec   : > { %v3232_v31 = vpop.f32.mrf.mxu1 }
 0x3ed   : > { %v3987_v33 = vsel %vm1353_vm10, -1e+30, %v2077_v30 }
 0x3ee   : > { %v2072_v34 = vpop.f32.mrf.mxu1  ;;  %v2085_v36 = vsel %vm1358_vm9, %v3987_v33, -inf }
 0x3ef   : > { %2086 = vmax.xlane.f32.xlu0 %v2085_v36  ;;  %v2078_v32 = vmul.f32 0.35355338, %v2072_v34 }
 0x3f0   : > { %v3235_v38 = vpop.f32.mrf.mxu1 }
 0x3f1   : > { %v3996_v39 = vsel %vm1354_vm11, -1e+30, %v2078_v32 }
 0x3f2   : > { %v2088_v35 = vsel %vm1358_vm9, %v3996_v39, -inf }
 0x3fc   : > { %1876 = vrot.lane.b32.xlu1 %v3819_v6, %s3475_s10 }
 0x405   : > { %1878 = vrot.lane.b32.xlu0 %v3815_v4, %s3475_s10 }
 0x420   : > { %2089 = vmax.xlane.f32.xlu1 %v2088_v35 }
 0x458   : > { %v1361_v42 = vpop.xlane.xlu1 %1360 }
 0x459   : > { %v1368_v43 = vsub.f32 %v3926_v37, %v1361_v42 }
 0x45b   : > { %v1371_v44 = vmul.f32 1.442695, %v1368_v43 }
 0x45c   : > { %v1602_v48 = vpop.xlane.xlu1 %1601  ;;  %v1364_v49 = vpop.xlane.xlu0 %1363 }
 0x45d   : > { %3360 = vpow2.f32 %v1371_v44  ;;  %v1609_v50 = vsub.f32 %v3933_v45, %v1602_v48  ;;  %v1369_v47 = vsub.f32 %v3937_v46, %v1364_v49 }
 0x45f   : > { %v1612_v51 = vmul.f32 1.442695, %v1609_v50  ;;  %v1373_v52 = vmul.f32 1.442695, %v1369_v47 }
 0x460   : > { %v1605_v53 = vpop.xlane.xlu0 %1604 }
 0x461   : > { %3362 = vpow2.f32 %v1612_v51  ;;  %v1610_v55 = vsub.f32 %v3948_v57, %v1605_v53 }
 0x462   : > { %3364 = vpow2.f32 %v1373_v52 }
 0x463   : > { %v1614_v56 = vmul.f32 1.442695, %v1610_v55 }
 0x464   : > { %v1367_v61 = vpop.xlane.xlu0 %1366  ;;  %v1608_v10 = vpop.xlane.xlu1 %1607 }
 0x465   : > { %3366 = vpow2.f32 %v1614_v56  ;;  %v1370_v37 = vsub.f32 %v3953_v1, %v1367_v61  ;;  %v1611_v13 = vsub.f32 %v3956_v3, %v1608_v10 }
 0x467   : > { %v1375_v62 = vmul.f32 1.442695, %v1370_v37  ;;  %v1616_v15 = vmul.f32 1.442695, %v1611_v13 }
 0x468   : > { %v1843_v12 = vpop.xlane.xlu0 %1842 }
 0x469   : > { %3368 = vpow2.f32 %v1375_v62  ;;  %v1850_v17 = vsub.f32 %v3964_v11, %v1843_v12 }
 0x46a   : > { %v4009_v0 = vpop.eup %3360  ;;  %3370 = vpow2.f32 %v1616_v15 }
 0x46b   : > { %v1377_v45 = vsel %vm1358_vm9, %v4009_v0, 0.0  ;;  %v1853_v20 = vmul.f32 1.442695, %v1850_v17 }
 0x46c   : > { %1378 = vadd.xlane.f32.xlu0 %v1377_v45  ;;  %v1846_v18 = vpop.xlane.xlu1 %1845 }
 0x46d   : > { %v1851_v22 = vsub.f32 %v3970_v16, %v1846_v18  ;;  %3372 = vpow2.f32 %v1853_v20 }
 0x46e   : > { %v4013_v46 = vpop.eup %3362 }
 0x46f   : > { %v1618_v2 = vsel %vm1358_vm9, %v4013_v46, 0.0  ;;  %v4017_v57 = vpop.eup %3364  ;;  %v1855_v25 = vmul.f32 1.442695, %v1851_v22 }
 0x470   : > { %1619 = vadd.xlane.f32.xlu1 %v1618_v2  ;;  %v1380_v1 = vsel %vm1358_vm9, %v4017_v57, 0.0  ;;  %v1849_v14 = vpop.xlane.xlu0 %1848 }
 0x471   : > { %v1852_v19 = vsub.f32 %v3975_v21, %v1849_v14 }
 0x472   : > { %v4019_v5 = vpop.eup %3366 }
 0x473   : > { %v1621_v7 = vsel %vm1358_vm9, %v4019_v5, 0.0  ;;  %v1857_v23 = vmul.f32 1.442695, %v1852_v19 }
 0x474   : > { %1381 = vadd.xlane.f32.xlu1 %v1380_v1  ;;  %1622 = vadd.xlane.f32.xlu0 %v1621_v7  ;;  %v2084_v24 = vpop.xlane.xlu1 %2083 }
 0x475   : > { %v2091_v27 = vsub.f32 %v3981_v26, %v2084_v24  ;;  %3374 = vpow2.f32 %v1857_v23 }
 0x476   : > { %v4025_v8 = vpop.eup %3368  ;;  %3376 = vpow2.f32 %v1855_v25 }
 0x477   : > { %v1383_v9 = vsel %vm1358_vm9, %v4025_v8, 0.0  ;;  %v2094_v3 = vmul.f32 1.442695, %v2091_v27  ;;  %v4039_v30 = vpop.eup %3370 }
 0x478   : > { %1384 = vadd.xlane.f32.xlu0 %v1383_v9  ;;  %v4041_v21 = vpop.permute.xlu1 %1876  ;;  %v1624_v16 = vsel %vm1358_vm9, %v4039_v30, 0.0 }
 0x479   : > { %3378 = vpow2.f32 %v2094_v3 }
 0x47a   : > { %v4045_v31 = vpop.eup %3372 }
 0x482   : > { %v4047_v26 = vpop.eup %3374 }
 0x483   : > { %v4052_v32 = vpop.eup %3376  ;;  %v1865_v35 = vsel %vm1358_vm9, %v4047_v26, 0.0 }
 0x484   : > { %v1862_v42 = vsel %vm1358_vm9, %v4052_v32, 0.0 }
 0x485   : > { %1874 = vrot.lane.b32.xlu1 %v3812_v63, %s3475_s10 }
 0x486   : > { %v4058_v43 = vpop.eup %3378 }
 0x48e   : > { %2119 = vrot.lane.b32.xlu0 %v3815_v4, %s3476_s27  ;;  %v2087_v4 = vpop.xlane.xlu0 %2086 }
 0x48f   : > { %v2092_v28 = vsub.f32 %v3987_v33, %v2087_v4  ;;  %v1859_v33 = vsel %vm1358_vm9, %v4045_v31, 0.0 }
 0x491   : > { %v2096_v11 = vmul.f32 1.442695, %v2092_v28 }
 0x492   : > { %v1879_v47 = vpop.permute.xlu0 %1878 }
 0x493   : > { %3380 = vpow2.f32 %v2096_v11 }
 0x4a0   : > { %v4062_v44 = vpop.eup %3380 }
 0x4a1   : > { %v2103_v48 = vsel %vm1358_vm9, %v4062_v44, 0.0 }
 0x4a9   : > { %v2090_v34 = vpop.xlane.xlu1 %2089  ;;  %1625 = vadd.xlane.f32.xlu1 %v1624_v16 }
 0x4aa   : > { %v2093_v36 = vsub.f32 %v3996_v39, %v2090_v34  ;;  %v2100_v39 = vsel %vm1358_vm9, %v4058_v43, 0.0 }
 0x4ac   : > { %v2098_v38 = vmul.f32 1.442695, %v2093_v36 }
 0x4ad   : > { %1860 = vadd.xlane.f32.xlu1 %v1859_v33  ;;  %1866 = vadd.xlane.f32.xlu0 %v1865_v35  ;;  %v1122_v35 = vld [vmem:[%s3614_s30 + $0x10] sm:$0xff] }
 0x4ae   : > { %3382 = vpow2.f32 %v2098_v38 }
 0x4b1   : > { %1863 = vadd.xlane.f32.xlu1 %v1862_v42  ;;  %v1121_v42 = vld [vmem:[%s3614_s30 + $0x8] sm:$0xff] }
 0x4b5   : > { %2101 = vadd.xlane.f32.xlu1 %v2100_v39 }
 0x4b9   : > { %2104 = vadd.xlane.f32.xlu1 %v2103_v48  ;;  %v1120_v48 = vld [vmem:[%s3614_s30] sm:$0xff] }
 0x4bb   : > { %v4066_v49 = vpop.eup %3382 }
 0x4bc   : > { %v2106_v50 = vsel %vm1358_vm9, %v4066_v49, 0.0 }
 0x4bd   : > { %2107 = vadd.xlane.f32.xlu0 %v2106_v50 }
 0x4ca   : > { %2117 = vrot.lane.b32.xlu1 %v3819_v6, %s3476_s27 }
 0x4d3   : > { %2115 = vrot.lane.b32.xlu0 %v3812_v63, %s3476_s27 }
 0x4f5   : > { %v1379_v51 = vpop.xlane.xlu0 %1378 }
 0x4f6   : > { %3384 = vrcp.f32 %v1379_v51 }
 0x4f9   : > { %v1620_v52 = vpop.xlane.xlu1 %1619 }
 0x4fd   : > { %v1382_v53 = vpop.xlane.xlu1 %1381  ;;  %v1623_v55 = vpop.xlane.xlu0 %1622 }
 0x4fe   : > { %3386 = vrcp.f32 %v1382_v53 }
 0x501   : > { %v1385_v56 = vpop.xlane.xlu0 %1384  ;;  %v1875_v2 = vpop.permute.xlu1 %1874 }
 0x502   : > { %3388 = vrcp.f32 %v1385_v56 }
 0x503   : > { %v3385_v61 = vpop.eup %3384  ;;  %3390 = vrcp.f32 %v1620_v52 }
 0x504   : > { %v1389_v37 = vmul.f32 %v3385_v61, %v4009_v0  ;;  %3392 = vrcp.f32 %v1623_v55 }
 0x506   : > { %3153 = vmatmul.mubr.msk.f32.vlgmr.msra.gmra.mxu0 %vm1358_vm9, %v1389_v37 }
 0x507   : > { %3177 = vmatpush3.msra.mxu0 %v4002_v41  ;;  %3155 = vmatprep.mubr.msk.f32.mxu0 %vm3465_vm5, %v3464_v54 }
 0x508   : > { %3178 = vmatprep.subr.mxu0 %v3464_v54 }
 0x509   : > { %3179 = vmatpush3.msra.mxu0 %v4000_v40 }
 0x50a   : > { %3180 = vmatprep.subr.mxu0 %v3464_v54 }
 0x50b   : > { %v3387_v63 = vpop.eup %3386  ;;  %3181 = vmatpush3.msra.mxu0 %v3906_v29 }
 0x50c   : > { %v1390_v6 = vmul.f32 %v3387_v63, %v4017_v57  ;;  %3206 = vmatprep.subr.mxu0 %v3464_v54  ;;  %v2120_v57 = vpop.permute.xlu0 %2119 }
 0x50e   : > { %3156 = vmatmul.mubr.msk.f32.gmra.mxu0 %vm1358_vm9, %v1390_v6 }
 0x50f   : > { %3158 = vmatprep.mubr.msk.f32.mxu0 %vm3465_vm5, %v3464_v54  ;;  %v3389_v41 = vpop.eup %3388 }
 0x510   : > { %v1391_v62 = vmul.f32 %v3389_v41, %v4025_v8  ;;  %v3391_v0 = vpop.eup %3390 }
 0x511   : > { %v1630_v29 = vmul.f32 %v3391_v0, %v4013_v46  ;;  %v3393_v40 = vpop.eup %3392 }
 0x512   : > { %3159 = vmatmul.mubr.msk.f32.gmra.mxu0 %vm1358_vm9, %v1391_v62  ;;  %v1631_v45 = vmul.f32 %v3393_v40, %v4019_v5 }
 0x513   : > { %3182 = vmatprep.mubr.msk.f32.mxu0 %vm3465_vm5, %v3464_v54 }
 0x516   : > { %3183 = vmatmul.mubr.msk.f32.vlgmr.msra.gmra.mxu0 %vm1358_vm9, %v1630_v29 }
 0x517   : > { %3207 = vmatpush3.msra.mxu0 %v1879_v47  ;;  %3185 = vmatprep.mubr.msk.f32.mxu0 %vm3465_vm5, %v3464_v54 }
 0x518   : > { %3208 = vmatprep.subr.mxu0 %v3464_v54 }
 0x519   : > { %3209 = vmatpush3.msra.mxu0 %v4041_v21 }
 0x51a   : > { %3210 = vmatprep.subr.mxu0 %v3464_v54  ;;  %3186 = vmatmul.mubr.msk.f32.gmra.mxu0 %vm1358_vm9, %v1631_v45 }
 0x51b   : > { %3211 = vmatpush3.msra.mxu0 %v1875_v2  ;;  %3188 = vmatprep.mubr.msk.f32.mxu0 %vm3465_vm5, %v3464_v54 }
 0x51c   : > { %3236 = vmatprep.subr.mxu0 %v3464_v54 }
 0x532   : > { %v1626_v46 = vpop.xlane.xlu1 %1625 }
 0x533   : > { %3394 = vrcp.f32 %v1626_v46 }
 0x536   : > { %v1861_v1 = vpop.xlane.xlu1 %1860  ;;  %v1867_v7 = vpop.xlane.xlu0 %1866 }
 0x537   : > { %3396 = vrcp.f32 %v1861_v1 }
 0x53a   : > { %v1864_v5 = vpop.xlane.xlu1 %1863 }
 0x53b   : > { %3398 = vrcp.f32 %v1864_v5 }
 0x53c   : > { %3400 = vrcp.f32 %v1867_v7 }
 0x53e   : > { %v2102_v8 = vpop.xlane.xlu1 %2101 }
 0x53f   : > { %3402 = vrcp.f32 %v2102_v8 }
 0x540   : > { %v3395_v9 = vpop.eup %3394 }
 0x541   : > { %v1632_v10 = vmul.f32 %v3395_v9, %v4039_v30 }
 0x542   : > { %v2105_v12 = vpop.xlane.xlu1 %2104 }
 0x543   : > { %3189 = vmatmul.mubr.msk.f32.gmra.mxu0 %vm1358_vm9, %v1632_v10  ;;  %3404 = vrcp.f32 %v2105_v12 }
 0x544   : > { %v3397_v13 = vpop.eup %3396  ;;  %3212 = vmatprep.mubr.msk.f32.mxu0 %vm3465_vm5, %v3464_v54 }
 0x545   : > { %v1871_v14 = vmul.f32 %v3397_v13, %v4045_v31 }
 0x546   : > { %v2108_v15 = vpop.xlane.xlu0 %2107  ;;  %v2118_v18 = vpop.permute.xlu1 %2117 }
 0x547   : > { %3213 = vmatmul.mubr.msk.f32.vlgmr.msra.gmra.mxu0 %vm1358_vm9, %v1871_v14  ;;  %3406 = vrcp.f32 %v2108_v15  ;;  %v2917_v14 = vld [vmem:[%s4352_s8] ss:$0 sm:$0xff] }
 0x548   : > { %v3399_v17 = vpop.eup %3398  ;;  %3237 = vmatpush3.msra.mxu0 %v2120_v57  ;;  %3215 = vmatprep.mubr.msk.f32.mxu0 %vm3465_vm5, %v3464_v54 }
 0x549   : > { %3238 = vmatprep.subr.mxu0 %v3464_v54  ;;  %v1872_v19 = vmul.f32 %v3399_v17, %v4052_v32  ;;  %v3401_v20 = vpop.eup %3400  ;;  %v1123_v32 = vld [vmem:[%s3614_s30 + $0x18] sm:$0xff] }
 0x54a   : > { %3239 = vmatpush3.msra.mxu0 %v2118_v18  ;;  %v2116_v22 = vpop.permute.xlu0 %2115  ;;  %v1873_v23 = vmul.f32 %v3401_v20, %v4047_v26  ;;  %3252 = vmatpush3.msra.mxu1 %v1123_v32 }
 0x54b   : > { %3240 = vmatprep.subr.mxu0 %v3464_v54  ;;  %3216 = vmatmul.mubr.msk.f32.gmra.mxu0 %vm1358_vm9, %v1872_v19 }
 0x54c   : > { %3241 = vmatpush3.msra.mxu0 %v2116_v22  ;;  %3218 = vmatprep.mubr.msk.f32.mxu0 %vm3465_vm5, %v3464_v54  ;;  %v3403_v24 = vpop.eup %3402 }
 0x54d   : > { %3268 = vmatprep.subr.mxu0 %v3464_v54  ;;  %v2112_v25 = vmul.f32 %v3403_v24, %v4058_v43  ;;  %3253 = vmatprep.subr.mxu1 %v3464_v54 }
 0x54e   : > { %3254 = vmatpush3.msra.mxu1 %v1122_v35 }
 0x54f   : > { %3219 = vmatmul.mubr.msk.f32.gmra.mxu0 %vm1358_vm9, %v1873_v23  ;;  %3255 = vmatprep.subr.mxu1 %v3464_v54 }
 0x550   : > { %3242 = vmatprep.mubr.msk.f32.mxu0 %vm3465_vm5, %v3464_v54  ;;  %v3405_v27 = vpop.eup %3404  ;;  %3256 = vmatpush3.msra.mxu1 %v1121_v42 }
 0x551   : > { %v2113_v4 = vmul.f32 %v3405_v27, %v4062_v44  ;;  %3257 = vmatprep.subr.mxu1 %v3464_v54 }
 0x552   : > { %3258 = vmatpush3.msra.mxu1 %v1120_v48  ;;  %v1126_v48 = vld [vmem:[%s3623_s5 + $0x8] sm:$0xff] }
 0x553   : > { %3243 = vmatmul.mubr.msk.f32.vlgmr.msra.gmra.mxu0 %vm1358_vm9, %v2112_v25  ;;  %3285 = vmatprep.subr.mxu1 %v3464_v54 }
 0x554   : > { %3245 = vmatprep.mubr.msk.f32.mxu0 %vm3465_vm5, %v3464_v54  ;;  %v3407_v3 = vpop.eup %3406 }
 0x555   : > { %v2114_v28 = vmul.f32 %v3407_v3, %v4066_v49 }
 0x557   : > { %3246 = vmatmul.mubr.msk.f32.gmra.mxu0 %vm1358_vm9, %v2113_v4 }
 0x558   : > { %3248 = vmatprep.mubr.msk.f32.mxu0 %vm3465_vm5, %v3464_v54 }
 0x55b   : > { %3249 = vmatmul.mubr.msk.f32.gmra.mxu0 %vm1358_vm9, %v2114_v28 }
 0x55c   : > { %3276 = vmatprep.mubr.msk.f32.mxu0 %vm3465_vm5, %v3464_v54 }
 0x5c6   : > { %v1476_v11 = vpop.f32.mrf.mxu0 }
 0x5c8   : > { %v3154_v30 = vpop.f32.mrf.mxu0 }
 0x5ce   : > { %v1481_v21 = vpop.f32.mrf.mxu0 }
 0x5d0   : > { %v3157_v16 = vpop.f32.mrf.mxu0 }
 0x5d2   : > { %v4135_v31 = vpop.f32.mrf.mxu0 }
 0x5d4   : > { %v3160_v34 = vpop.f32.mrf.mxu0 }
 0x5d6   : > { %v1717_v26 = vpop.f32.mrf.mxu0 }
 0x5d7   : > { %2216 = vrot.lane.b32.xlu1 %v1717_v26, %s3477_s29 }
 0x5d8   : > { %v3184_v36 = vpop.f32.mrf.mxu0 }
 0x5da   : > { %v1722_v38 = vpop.f32.mrf.mxu0 }
 0x5db   : > { %2218 = vrot.lane.b32.xlu0 %v1722_v38, %s3477_s29 }
 0x5dc   : > { %v3187_v33 = vpop.f32.mrf.mxu0 }
 0x603   : > { %v1727_v43 = vpop.f32.mrf.mxu0 }
 0x605   : > { %v3190_v39 = vpop.f32.mrf.mxu0 }
 0x606   : > { %v1128_v39 = vld [vmem:[%s3623_s5 + $0x18] sm:$0xff] }
 0x607   : > { %v1958_v44 = vpop.f32.mrf.mxu0  ;;  %3269 = vmatpush3.msra.mxu0 %v1128_v39 }
 0x608   : > { %2228 = vrot.lane.b32.xlu0 %v1958_v44, %s3478_s1  ;;  %3270 = vmatprep.subr.mxu0 %v3464_v54  ;;  %v1127_v44 = vld [vmem:[%s3623_s5 + $0x10] sm:$0xff] }
 0x609   : > { %v3214_v49 = vpop.f32.mrf.mxu0  ;;  %3271 = vmatpush3.msra.mxu0 %v1127_v44 }
 0x60a   : > { %3272 = vmatprep.subr.mxu0 %v3464_v54  ;;  %v1125_v49 = vld [vmem:[%s3623_s5] sm:$0xff] }
 0x60b   : > { %v1963_v50 = vpop.f32.mrf.mxu0  ;;  %3273 = vmatpush3.msra.mxu0 %v1126_v48 }
 0x60c   : > { %2230 = vrot.lane.b32.xlu1 %v1963_v50, %s3478_s1  ;;  %3274 = vmatprep.subr.mxu0 %v3464_v54 }
 0x60d   : > { %v3217_v47 = vpop.f32.mrf.mxu0  ;;  %3275 = vmatpush3.msra.mxu0 %v1125_v49 }
 0x60f   : > { %v1968_v51 = vpop.f32.mrf.mxu0 }
 0x611   : > { %v3220_v52 = vpop.f32.mrf.mxu0 }
 0x613   : > { %v2199_v53 = vpop.f32.mrf.mxu0 }
 0x614   : > { %2240 = vrot.lane.b32.xlu1 %v2199_v53, %s3479_s2 }
 0x615   : > { %v3244_v55 = vpop.f32.mrf.mxu0 }
 0x617   : > { %v2204_v56 = vpop.f32.mrf.mxu0 }
 0x618   : > { %2220 = vrot.lane.b32.xlu1 %v1727_v43, %s3477_s29  ;;  %2242 = vrot.lane.b32.xlu0 %v2204_v56, %s3479_s2 }
 0x619   : > { %v3247_v61 = vpop.f32.mrf.mxu0 }
 0x61b   : > { %v2209_v37 = vpop.f32.mrf.mxu0 }
 0x61c   : > { %2232 = vrot.lane.b32.xlu0 %v1968_v51, %s3478_s1  ;;  %2244 = vrot.lane.b32.xlu1 %v2209_v37, %s3479_s2  ;;  %s4353_s1 = sld [smem:[#allocation17_spill]] }
 0x61d   : > { %v3250_v63 = vpop.f32.mrf.mxu0 }
 0x622   : > { %s4354_s2 = scalar_lea.vmem %s4353_s1, %s3599_s23 }
 0x649   : > { %v2217_v6 = vpop.permute.xlu1 %2216 }
 0x64a   : > { %v2249_v29 = vsel %vm1256_vm7, %v1476_v11, %v2217_v6  ;;  %v2921_v6 = vld [vmem:[%s778_s7] ss:$0 sm:$0xff] }
 0x64d   : > { %v2219_v41 = vpop.permute.xlu0 %2218 }
 0x64e   : > { %v2250_v46 = vsel %vm1256_vm7, %v1481_v21, %v2219_v41 }
 0x67a   : > { %v2229_v0 = vpop.permute.xlu0 %2228 }
 0x67b   : > { %v2253_v40 = vsel %vm2252_vm12, %v2249_v29, %v2229_v0 }
 0x67e   : > { %v2231_v62 = vpop.permute.xlu1 %2230 }
 0x67f   : > { %v2254_v57 = vsel %vm2252_vm12, %v2250_v46, %v2231_v62  ;;  %v2922_v62 = vld [vmem:[%s781_s12] ss:$0 sm:$0xff] }
 0x686   : > { %v2241_v45 = vpop.permute.xlu1 %2240 }
 0x687   : > { %v2256_v2 = vsel %vm1358_vm9, %v2253_v40, %v2241_v45 }
 0x688   : > { %3260 = vmatmul.mubr.msk.f32.vlgmr.msra.gmra.mxu1 %vm1157_vm6, %v2256_v2 }
 0x689   : > { %3262 = vmatprep.mubr.msk.f32.mxu1 %vm3465_vm5, %v3464_v54 }
 0x68a   : > { %v2221_v1 = vpop.permute.xlu1 %2220  ;;  %v2243_v7 = vpop.permute.xlu0 %2242 }
 0x68b   : > { %v2257_v5 = vsel %vm1358_vm9, %v2254_v57, %v2243_v7  ;;  %v2251_v8 = vsel %vm1256_vm7, %v4135_v31, %v2221_v1 }
 0x68c   : > { %3263 = vmatmul.mubr.msk.f32.gmra.mxu1 %vm1157_vm6, %v2257_v5 }
 0x68d   : > { %3265 = vmatprep.mubr.msk.f32.mxu1 %vm3465_vm5, %v3464_v54 }
 0x68e   : > { %v2233_v9 = vpop.permute.xlu0 %2232  ;;  %v2245_v10 = vpop.permute.xlu1 %2244 }
 0x68f   : > { %v2255_v12 = vsel %vm2252_vm12, %v2251_v8, %v2233_v9  ;;  %v1145_v8 = vld [vmem:[%s3633_s4 + $0x78] sm:$0xff]  ;;  %v1144_v9 = vld [vmem:[%s3633_s4 + $0x70] sm:$0xff] }
 0x690   : > { %v2258_v13 = vsel %vm1358_vm9, %v2255_v12, %v2245_v10  ;;  %3286 = vmatpush3.msra.mxu1 %v1145_v8  ;;  %v1143_v10 = vld [vmem:[%s3633_s4 + $0x68] sm:$0xff]  ;;  %v1142_v12 = vld [vmem:[%s3633_s4 + $0x60] sm:$0xff] }
 0x691   : > { %3266 = vmatmul.mubr.msk.f32.gmra.mxu1 %vm1157_vm6, %v2258_v13  ;;  %3287 = vmatprep.subr.mxu1 %v3464_v54  ;;  %v1141_v13 = vld [vmem:[%s3633_s4 + $0x58] sm:$0xff] }
 0x692   : > { %3317 = vmatprep.mubr.msk.f32.mxu1 %vm3465_vm5, %v3464_v54  ;;  %3288 = vmatpush3.msra.mxu1 %v1144_v9 }
 0x693   : > { %3289 = vmatprep.subr.mxu1 %v3464_v54 }
 0x694   : > { %3290 = vmatpush3.msra.mxu1 %v1143_v10 }
 0x695   : > { %3291 = vmatprep.subr.mxu1 %v3464_v54 }
 0x696   : > { %3292 = vmatpush3.msra.mxu1 %v1142_v12 }
 0x697   : > { %3293 = vmatprep.subr.mxu1 %v3464_v54 }
 0x698   : > { %3294 = vmatpush3.msra.mxu1 %v1141_v13 }
 0x699   : > { %3295 = vmatprep.subr.mxu1 %v3464_v54 }
 0x748   : > { %v2340_v15 = vpop.f32.mrf.mxu1 }
 0x749   : > { %v2341_v17 = vadd.f32 %v2917_v14, %v2340_v15  ;;  %v1139_v15 = vld [vmem:[%s3633_s4 + $0x48] sm:$0xff] }
 0x74a   : > { %v3261_v18 = vpop.f32.mrf.mxu1 }
 0x74b   : > { %v2354_v19 = vadd.f32 %v2341_v17, %v3787_v58  ;;  %v1138_v17 = vld [vmem:[%s3633_s4 + $0x40] sm:$0xff]  ;;  %v1137_v18 = vld [vmem:[%s3633_s4 + $0x38] sm:$0xff] }
 0x74c   : > { %v2345_v20 = vpop.f32.mrf.mxu1 }
 0x74d   : > { %v2346_v22 = vadd.f32 %v2917_v14, %v2345_v20  ;;  %v2357_v23 = vsel %vm1157_vm6, %v2354_v19, 0.0  ;;  %v1135_v20 = vld [vmem:[%s3633_s4 + $0x28] sm:$0xff] }
 0x74e   : > { %2358 = vadd.xlane.f32.xlu0 %v2357_v23  ;;  %v3264_v24 = vpop.f32.mrf.mxu1  ;;  %v1133_v23 = vld [vmem:[%s3633_s4 + $0x18] sm:$0xff] }
 0x74f   : > { %v2355_v25 = vadd.f32 %v2346_v22, %v3795_v59  ;;  %v1134_v22 = vld [vmem:[%s3633_s4 + $0x20] sm:$0xff]  ;;  %v1132_v24 = vld [vmem:[%s3633_s4 + $0x10] sm:$0xff] }
 0x751   : > { %v2350_v27 = vpop.f32.mrf.mxu1  ;;  %v2360_v4 = vsel %vm1157_vm6, %v2355_v25, 0.0 }
 0x752   : > { %v2351_v3 = vadd.f32 %v2917_v14, %v2350_v27  ;;  %2361 = vadd.xlane.f32.xlu1 %v2360_v4  ;;  %v1140_v14 = vld [vmem:[%s3633_s4 + $0x50] sm:$0xff]  ;;  %v1130_v27 = vld [vmem:[%s3633_s4] sm:$0xff] }
 0x753   : > { %v3267_v28 = vpop.f32.mrf.mxu1  ;;  %3296 = vmatpush3.msra.mxu1 %v1140_v14  ;;  %v2923_v4 = vld [vmem:[%s4354_s2] ss:$0 sm:$0xff] }
 0x754   : > { %v2356_v11 = vadd.f32 %v2351_v3, %v3801_v60  ;;  %3297 = vmatprep.subr.mxu1 %v3464_v54 }
 0x755   : > { %3298 = vmatpush3.msra.mxu1 %v1139_v15 }
 0x756   : > { %v2363_v30 = vsel %vm1157_vm6, %v2356_v11, 0.0  ;;  %3299 = vmatprep.subr.mxu1 %v3464_v54 }
 0x757   : > { %2364 = vadd.xlane.f32.xlu0 %v2363_v30  ;;  %3300 = vmatpush3.msra.mxu1 %v1138_v17 }
 0x758   : > { %3301 = vmatprep.subr.mxu1 %v3464_v54 }
 0x759   : > { %3302 = vmatpush3.msra.mxu1 %v1137_v18 }
 0x75a   : > { %3303 = vmatprep.subr.mxu1 %v3464_v54 }
 0x7d7   : > { %v2359_v58 = vpop.xlane.xlu0 %2358 }
 0x7d8   : > { %v2367_v21 = vmul.f32 0.03125, %v2359_v58 }
 0x7da   : > { %v2370_v16 = vsub.f32 %v2354_v19, %v2367_v21  ;;  %v1136_v19 = vld [vmem:[%s3633_s4 + $0x30] sm:$0xff] }
 0x7db   : > { %v2362_v31 = vpop.xlane.xlu1 %2361  ;;  %3304 = vmatpush3.msra.mxu1 %v1136_v19 }
 0x7dc   : > { %v2368_v34 = vmul.f32 0.03125, %v2362_v31  ;;  %v2373_v26 = vmul.f32 %v2370_v16, %v2370_v16  ;;  %3305 = vmatprep.subr.mxu1 %v3464_v54 }
 0x7dd   : > { %3306 = vmatpush3.msra.mxu1 %v1135_v20 }
 0x7de   : > { %v2371_v59 = vsub.f32 %v2355_v25, %v2368_v34  ;;  %v2376_v36 = vsel %vm1157_vm6, %v2373_v26, 0.0  ;;  %3307 = vmatprep.subr.mxu1 %v3464_v54  ;;  %v1131_v25 = vld [vmem:[%s3633_s4 + $0x8] sm:$0xff] }
 0x7df   : > { %2377 = vadd.xlane.f32.xlu0 %v2376_v36  ;;  %3308 = vmatpush3.msra.mxu1 %v1134_v22 }
 0x7e0   : > { %v2365_v38 = vpop.xlane.xlu0 %2364  ;;  %v2374_v33 = vmul.f32 %v2371_v59, %v2371_v59  ;;  %3309 = vmatprep.subr.mxu1 %v3464_v54 }
 0x7e1   : > { %v2369_v60 = vmul.f32 0.03125, %v2365_v38  ;;  %3310 = vmatpush3.msra.mxu1 %v1133_v23 }
 0x7e2   : > { %v2379_v32 = vsel %vm1157_vm6, %v2374_v33, 0.0  ;;  %3311 = vmatprep.subr.mxu1 %v3464_v54 }
 0x7e3   : > { %v2372_v35 = vsub.f32 %v2356_v11, %v2369_v60  ;;  %2380 = vadd.xlane.f32.xlu1 %v2379_v32  ;;  %3312 = vmatpush3.msra.mxu1 %v1132_v24 }
 0x7e4   : > { %3313 = vmatprep.subr.mxu1 %v3464_v54 }
 0x7e5   : > { %v2375_v42 = vmul.f32 %v2372_v35, %v2372_v35  ;;  %3314 = vmatpush3.msra.mxu1 %v1131_v25 }
 0x7e6   : > { %3315 = vmatprep.subr.mxu1 %v3464_v54 }
 0x7e7   : > { %v2382_v43 = vsel %vm1157_vm6, %v2375_v42, 0.0  ;;  %3316 = vmatpush3.msra.mxu1 %v1130_v27 }
 0x7e8   : > { %2383 = vadd.xlane.f32.xlu0 %v2382_v43 }
 0x868   : > { %v2378_v50 = vpop.xlane.xlu0 %2377 }
 0x869   : > { %v2385_v47 = vmul.f32 0.03125, %v2378_v50 }
 0x86b   : > { %v2388_v51 = vadd.f32 1e-05, %v2385_v47 }
 0x86c   : > { %v2381_v52 = vpop.xlane.xlu1 %2380 }
 0x86d   : > { %3408 = vrsqrt.f32 %v2388_v51  ;;  %v2386_v53 = vmul.f32 0.03125, %v2381_v52 }
 0x86f   : > { %v2389_v55 = vadd.f32 1e-05, %v2386_v53 }
 0x871   : > { %3410 = vrsqrt.f32 %v2389_v55  ;;  %v2384_v56 = vpop.xlane.xlu0 %2383 }
 0x872   : > { %v2387_v61 = vmul.f32 0.03125, %v2384_v56 }
 0x874   : > { %v2390_v37 = vadd.f32 1e-05, %v2387_v61 }
 0x876   : > { %3412 = vrsqrt.f32 %v2390_v37 }
 0x87a   : > { %v3409_v63 = vpop.eup %3408 }
 0x87b   : > { %v2394_v41 = vmul.f32 %v3409_v63, %v2370_v16 }
 0x87d   : > { %v2403_v0 = vmul.f32 %v2921_v6, %v2394_v41 }
 0x87e   : > { %v3411_v29 = vpop.eup %3410 }
 0x87f   : > { %v4198_v40 = vadd.f32 %v2922_v62, %v2403_v0  ;;  %v2395_v45 = vmul.f32 %v3411_v29, %v2371_v59  ;;  %v2927_v0 = vld [vmem:[%s775_s0] ss:$0 sm:$0xff] }
 0x881   : > { %3277 = vmatmul.mubr.msk.f32.vlgmr.msra.gmra.mxu0 %vm1157_vm6, %v4198_v40  ;;  %v2404_v2 = vmul.f32 %v2921_v6, %v2395_v45 }
 0x882   : > { %3279 = vmatprep.mubr.msk.f32.mxu0 %vm3465_vm5, %v3464_v54 }
 0x883   : > { %v3413_v46 = vpop.eup %3412  ;;  %v4204_v57 = vadd.f32 %v2922_v62, %v2404_v2 }
 0x884   : > { %v2396_v1 = vmul.f32 %v3413_v46, %v2372_v35 }
 0x885   : > { %3280 = vmatmul.mubr.msk.f32.gmra.mxu0 %vm1157_vm6, %v4204_v57 }
 0x886   : > { %3282 = vmatprep.mubr.msk.f32.mxu0 %vm3465_vm5, %v3464_v54  ;;  %v2405_v7 = vmul.f32 %v2921_v6, %v2396_v1 }
 0x888   : > { %v4210_v5 = vadd.f32 %v2922_v62, %v2405_v7 }
 0x88a   : > { %3283 = vmatmul.mubr.msk.f32.gmra.mxu0 %vm1157_vm6, %v4210_v5 }
 0x941   : > { %v2496_v3 = vpop.f32.mrf.mxu0 }
 0x942   : > { %v2497_v28 = vadd.f32 %v2923_v4, %v2496_v3 }
 0x943   : > { %v3278_v11 = vpop.f32.mrf.mxu0 }
 0x944   : > { %v2513_v30 = vmul.f32 0.044715, %v2497_v28  ;;  %v2510_v51 = vmul.f32 0.5, %v2497_v28 }
 0x945   : > { %v2501_v58 = vpop.f32.mrf.mxu0 }
 0x946   : > { %v2516_v21 = vmul.f32 %v2513_v30, %v2497_v28  ;;  %v2502_v16 = vadd.f32 %v2923_v4, %v2501_v58 }
 0x947   : > { %v3281_v31 = vpop.f32.mrf.mxu0 }
 0x948   : > { %v2519_v34 = vmul.f32 %v2516_v21, %v2497_v28  ;;  %v2514_v26 = vmul.f32 0.044715, %v2502_v16  ;;  %v2511_v56 = vmul.f32 0.5, %v2502_v16 }
 0x94a   : > { %v2522_v59 = vadd.f32 %v2519_v34, %v2497_v28  ;;  %v2517_v36 = vmul.f32 %v2514_v26, %v2502_v16  ;;  %v2506_v38 = vpop.f32.mrf.mxu0 }
 0x94b   : > { %v2507_v33 = vadd.f32 %v2923_v4, %v2506_v38 }
 0x94c   : > { %v2525_v60 = vmul.f32 0.7978846, %v2522_v59  ;;  %v3284_v32 = vpop.f32.mrf.mxu0  ;;  %v2520_v35 = vmul.f32 %v2517_v36, %v2502_v16 }
 0x94d   : > { %v2515_v42 = vmul.f32 0.044715, %v2507_v33  ;;  %v2512_v6 = vmul.f32 0.5, %v2507_v33  ;;  %v2929_v32 = vld [vmem:[%s787_s3] ss:$0 sm:$0xff] }
 0x94e   : > { %3414 = vtanh.f32 %v2525_v60  ;;  %v2523_v43 = vadd.f32 %v2520_v35, %v2502_v16 }
 0x94f   : > { %v2518_v39 = vmul.f32 %v2515_v42, %v2507_v33 }
 0x950   : > { %v2526_v44 = vmul.f32 0.7978846, %v2523_v43 }
 0x951   : > { %v2521_v48 = vmul.f32 %v2518_v39, %v2507_v33 }
 0x952   : > { %3416 = vtanh.f32 %v2526_v44 }
 0x953   : > { %v2524_v49 = vadd.f32 %v2521_v48, %v2507_v33  ;;  %v2928_v33 = vld [vmem:[%s784_s26] ss:$0 sm:$0xff] }
 0x955   : > { %v2527_v50 = vmul.f32 0.7978846, %v2524_v49 }
 0x957   : > { %3418 = vtanh.f32 %v2527_v50 }
 0x95b   : > { %v3415_v47 = vpop.eup %3414 }
 0x95c   : > { %v2531_v52 = vadd.f32 1.0, %v3415_v47 }
 0x95e   : > { %v2534_v53 = vmul.f32 %v2531_v52, %v2510_v51 }
 0x95f   : > { %v3417_v55 = vpop.eup %3416 }
 0x960   : > { %3318 = vmatmul.mubr.f32.vlgmr.msra.gmra.mxu1 %v2534_v53  ;;  %v2532_v61 = vadd.f32 1.0, %v3417_v55 }
 0x961   : > { %3320 = vmatprep.mubr.msk.f32.mxu1 %vm3465_vm5, %v3464_v54 }
 0x962   : > { %v2535_v37 = vmul.f32 %v2532_v61, %v2511_v56 }
 0x964   : > { %v3419_v63 = vpop.eup %3418  ;;  %3321 = vmatmul.mubr.f32.gmra.mxu1 %v2535_v37 }
 0x965   : > { %3323 = vmatprep.mubr.msk.f32.mxu1 %vm3465_vm5, %v3464_v54  ;;  %v2533_v41 = vadd.f32 1.0, %v3419_v63 }
 0x967   : > { %v2536_v62 = vmul.f32 %v2533_v41, %v2512_v6 }
 0x969   : > { %3324 = vmatmul.mubr.f32.gmra.mxu1 %v2536_v62 }
 0xa20   : > { %v2609_v29 = vpop.f32.mrf.mxu1 }
 0xa21   : > { %v2610_v45 = vadd.f32 %v2927_v0, %v2609_v29 }
 0xa22   : > { %v3319_v2 = vpop.f32.mrf.mxu1 }
 0xa23   : > { %v2623_v46 = vadd.f32 %v2610_v45, %v4198_v40 }
 0xa24   : > { %v2614_v1 = vpop.f32.mrf.mxu1 }
 0xa25   : > { %v2615_v7 = vadd.f32 %v2927_v0, %v2614_v1  ;;  %v2626_v8 = vsel %vm1157_vm6, %v2623_v46, 0.0 }
 0xa26   : > { %2627 = vadd.xlane.f32.xlu1 %v2626_v8  ;;  %v3322_v54 = vpop.f32.mrf.mxu1 }
 0xa27   : > { %v2624_v9 = vadd.f32 %v2615_v7, %v4204_v57 }
 0xa29   : > { %v2619_v10 = vpop.f32.mrf.mxu1  ;;  %v2629_v12 = vsel %vm1157_vm6, %v2624_v9, 0.0 }
 0xa2a   : > { %v2620_v13 = vadd.f32 %v2927_v0, %v2619_v10  ;;  %2630 = vadd.xlane.f32.xlu0 %v2629_v12 }
 0xa2b   : > { %v3325_v14 = vpop.f32.mrf.mxu1 }
 0xa2c   : > { %v2625_v15 = vadd.f32 %v2620_v13, %v4210_v5 }
 0xa2e   : > { %v2632_v17 = vsel %vm1157_vm6, %v2625_v15, 0.0 }
 0xa2f   : > { %2633 = vadd.xlane.f32.xlu1 %v2632_v17 }
 0xaaf   : > { %v2628_v40 = vpop.xlane.xlu1 %2627 }
 0xab0   : > { %v2635_v18 = vmul.f32 0.03125, %v2628_v40 }
 0xab2   : > { %v2638_v19 = vsub.f32 %v2623_v46, %v2635_v18 }
 0xab3   : > { %v2631_v20 = vpop.xlane.xlu0 %2630 }
 0xab4   : > { %v2636_v22 = vmul.f32 0.03125, %v2631_v20  ;;  %v2641_v23 = vmul.f32 %v2638_v19, %v2638_v19 }
 0xab6   : > { %v2639_v24 = vsub.f32 %v2624_v9, %v2636_v22  ;;  %v2644_v57 = vsel %vm1157_vm6, %v2641_v23, 0.0 }
 0xab7   : > { %2645 = vadd.xlane.f32.xlu0 %v2644_v57 }
 0xab8   : > { %v2634_v25 = vpop.xlane.xlu1 %2633  ;;  %v2642_v27 = vmul.f32 %v2639_v24, %v2639_v24 }
 0xab9   : > { %v2637_v4 = vmul.f32 0.03125, %v2634_v25 }
 0xaba   : > { %v2647_v3 = vsel %vm1157_vm6, %v2642_v27, 0.0 }
 0xabb   : > { %v2640_v28 = vsub.f32 %v2625_v15, %v2637_v4  ;;  %2648 = vadd.xlane.f32.xlu1 %v2647_v3 }
 0xabd   : > { %v2643_v5 = vmul.f32 %v2640_v28, %v2640_v28 }
 0xabf   : > { %v2650_v11 = vsel %vm1157_vm6, %v2643_v5, 0.0 }
 0xac0   : > { %2651 = vadd.xlane.f32.xlu0 %v2650_v11 }
 0xb40   : > { %v2646_v30 = vpop.xlane.xlu0 %2645 }
 0xb41   : > { %v2653_v58 = vmul.f32 0.03125, %v2646_v30 }
 0xb43   : > { %v2656_v21 = vadd.f32 1e-05, %v2653_v58 }
 0xb44   : > { %v2649_v16 = vpop.xlane.xlu1 %2648 }
 0xb45   : > { %3420 = vrsqrt.f32 %v2656_v21  ;;  %v2654_v31 = vmul.f32 0.03125, %v2649_v16 }
 0xb47   : > { %v2657_v34 = vadd.f32 1e-05, %v2654_v31 }
 0xb49   : > { %3422 = vrsqrt.f32 %v2657_v34  ;;  %v2652_v26 = vpop.xlane.xlu0 %2651 }
 0xb4a   : > { %v2655_v59 = vmul.f32 0.03125, %v2652_v26 }
 0xb4c   : > { %v2658_v36 = vadd.f32 1e-05, %v2655_v59 }
 0xb4e   : > { %3424 = vrsqrt.f32 %v2658_v36 }
 0xb52   : > { %v3421_v38 = vpop.eup %3420 }
 0xb53   : > { %v2662_v60 = vmul.f32 %v3421_v38, %v2638_v19 }
 0xb55   : > { %v2671_v35 = vmul.f32 %v2928_v33, %v2662_v60 }
 0xb56   : > { %v3423_v42 = vpop.eup %3422 }
 0xb57   : > { %v2680_v43 = vadd.f32 %v2929_v32, %v2671_v35  ;;  %v2663_v39 = vmul.f32 %v3423_v42, %v2639_v24 }
 0xb59   : > { %2683 = vst.msk [vmem:[#allocation2] sm:$0xff] %vm1157_vm6, %v2680_v43  ;;  %v2672_v44 = vmul.f32 %v2928_v33, %v2663_v39 }
 0xb5b   : > { %v3425_v48 = vpop.eup %3424  ;;  %v2681_v49 = vadd.f32 %v2929_v32, %v2672_v44 }
 0xb5c   : > { %v2664_v50 = vmul.f32 %v3425_v48, %v2640_v28 }
 0xb5d   : > { %2684 = vst.msk [vmem:[#allocation2 + $0x8] sm:$0xff] %vm1157_vm6, %v2681_v49 }
 0xb5e   : > { %v2673_v47 = vmul.f32 %v2928_v33, %v2664_v50  ;;  %2689 = sbr.rel (%p2930_p5) target bundleno = 2923 (0xb6b), region = 108 }
 0xb60   : > { %v2682_v51 = vadd.f32 %v2929_v32, %v2673_v47 }
 0xb62   : > { %2685 = vst.msk [vmem:[#allocation2 + $0x10] sm:$0xff] %vm1157_vm6, %v2682_v51 }
 0xb63   : > { %v2690_v52 = vld [vmem:[#allocation2] sm:$0xff] }
 0xb64   : > { %v2691_v53 = vld [vmem:[#allocation2 + $0x8] sm:$0xff]  ;;  %2693 = vst.msk [vmem:[#allocation3] sm:$0xff] %vm1157_vm6, %v2690_v52 }
 0xb65   : > { %2694 = vst.msk [vmem:[#allocation3 + $0x8] sm:$0xff] %vm1157_vm6, %v2691_v53 }
 0xb69   : > { %v2692_v55 = vld [vmem:[#allocation2 + $0x10] sm:$0xff] }
 0xb6a   : > { %2695 = vst.msk [vmem:[#allocation3 + $0x10] sm:$0xff] %vm1157_vm6, %v2692_v55 }
 0xb6b PF: > { %p3330_p6 = scmp.eq.s32.totalorder %s3593_s22, 1  ;;  %s3480_s23 = smov [#allocation3]  }
 0xb6c   : > { %s2702_s26 = sshll.u32 %s3480_s23, 4  ;;  %s2703_s26 = int_to_ptr.vmem [resolvable:$true] %s2702_s26 }
 0xb6d   : > { %s3426_s3 = scalar_lea.vmem %s2703_s26, 384  ;;  %p3433_p10 = scmp.lt.s32.totalorder %s2703_s26, %s2703_s26 }
 0xb6e   : > { %p3427_p7 = scmp.ne.s32.totalorder %s2703_s26, %s3426_s3  ;;  %p3434_p11 = scmp.lt.s32.totalorder %s3426_s3, %s3426_s3 }
 0xb70   : > { %p3428_p8 = pnand %p3427_p7, %p3330_p6  ;;  %p3435_p12 = por %p3434_p11, %p3433_p10 }
 0xb72   : > { %p3429_p9 = pneg %p3428_p8 }
 0xb74   : > { %p3436_p13 = pnand %p3435_p12, %p3429_p9 }
 0xb76   : > { %3439 = shalt.err (!%p3436_p13)
}
 0xb77   : > { %s3481_s28 = smov 128   ;;  %s4355_s12 = sld [smem:[#allocation18_spill]] }
 0xb7d   : > { %3327 = dma.vmem_to_hbm [thread:$0]  (%p3330_p6), %s2703_s26, 384, %s4355_s12, [#allocation4], %s3481_s28, %s3481_s28, %s3477_s29  }
 0xb7e   : > { %3455 = dma.done.wait (%p3330_p6), [#allocation4], 384  }
 0xb7f   : > { %3457 = vsyncadd (%p3330_p6), [#allocation4], 4294966912 }
 0xb80 PF: > { %s4356_s7 = sld [smem:[#allocation6_spill]] }
 0xb86   : > { %s31_s1 = sadd.s32 1, %s4356_s7  }
 0xb87   : > { %p28_p0 = scmp.ge.s32.totalorder %s31_s1, 4  }
 0xb89   :  { %30 = sbr.rel (!%p28_p0) target bundleno = 14 (0xe), region = 168 }
 0xb8e   :  { %2718 = vsyncpa [#allocation4], 1 }
 0xb8f   :  { %2720 = vsyncpa [#allocation4 + $0x1], 1 }

</bundles_post_ra>
